<compile_context>
chip_gen: v5e
topology: v5e:2x2
jax: 0.10.0
libtpu: 0.0.40
codegen_flags: <defaults>
</compile_context>

<pallas_src>
import functools

import numpy as np
import jax
import jax.numpy as jnp
from jax import lax
from jax.experimental import pallas as pl
from jax.experimental.pallas import tpu as pltpu


# ---------------------------------------------------------------------------
# helpers
# ---------------------------------------------------------------------------
def _const_spec(shape):
    """BlockSpec covering the full array with a constant block index (stays
    VMEM-resident across the whole grid)."""
    zeros = (0,) * len(shape)
    return pl.BlockSpec(tuple(shape), lambda *_args: zeros)


def _row_block(n):
    """Pick a row tile size (multiple of 8) for the batched matmuls."""
    for c in (512, 256, 128):
        if n % c == 0 and n > c:
            return c
    return n


# ---------------------------------------------------------------------------
# Pallas kernel: Linear  (y = x @ W + b [, tanh]) — W stored pre-transposed
# ---------------------------------------------------------------------------
def _linear_kernel(x_ref, w_ref, b_ref, o_ref, *, act):
    y = jnp.dot(x_ref[...], w_ref[...],
                preferred_element_type=jnp.float32) + b_ref[...]
    if act == "tanh":
        y = jnp.tanh(y)
    o_ref[...] = y


def linear_pallas(x, w_t, b=None, act=None):
    """x [N, Din], w_t [Din, Dout] (pre-transposed), b [1, Dout] or None."""
    N, Din = x.shape
    Dout = w_t.shape[1]
    if b is None:
        b = jnp.zeros((1, Dout), jnp.float32)
    bm = _row_block(N)
    return pl.pallas_call(
        functools.partial(_linear_kernel, act=act),
        grid=(N // bm,),
        in_specs=[pl.BlockSpec((bm, Din), lambda i: (i, 0)),
                  _const_spec((Din, Dout)),
                  _const_spec((1, Dout))],
        out_specs=pl.BlockSpec((bm, Dout), lambda i: (i, 0)),
        out_shape=jax.ShapeDtypeStruct((N, Dout), jnp.float32),
        compiler_params=pltpu.CompilerParams(
            dimension_semantics=("parallel",)),
    )(x.astype(jnp.float32), w_t, b)


# ---------------------------------------------------------------------------
# Pallas kernel: fused LSTM recurrence over time (gates_x precomputed)
#   gates_x[t] already contains x_t @ W_ih^T + (b_ih + b_hh)
# ---------------------------------------------------------------------------
def _lstm_seq_kernel(gx_ref, whh_ref, hs_ref, h_sc, c_sc, *, H):
    t = pl.program_id(0)

    @pl.when(t == 0)
    def _init():
        h_sc[...] = jnp.zeros_like(h_sc)
        c_sc[...] = jnp.zeros_like(c_sc)

    gates = gx_ref[0] + jnp.dot(h_sc[...], whh_ref[...],
                                preferred_element_type=jnp.float32)
    i_g = jax.nn.sigmoid(gates[:, 0 * H:1 * H])
    f_g = jax.nn.sigmoid(gates[:, 1 * H:2 * H])
    g_g = jnp.tanh(gates[:, 2 * H:3 * H])
    o_g = jax.nn.sigmoid(gates[:, 3 * H:4 * H])
    c_new = f_g * c_sc[...] + i_g * g_g
    h_new = o_g * jnp.tanh(c_new)
    h_sc[...] = h_new
    c_sc[...] = c_new
    hs_ref[0] = h_new


def lstm_seq_pallas(gates_x, w_hh_t):
    """gates_x [T, B, 4H], w_hh_t [H, 4H] -> hidden states [T, B, H]."""
    T, B, G = gates_x.shape
    H = w_hh_t.shape[0]
    return pl.pallas_call(
        functools.partial(_lstm_seq_kernel, H=H),
        grid=(T,),
        in_specs=[pl.BlockSpec((1, B, G), lambda t: (t, 0, 0)),
                  _const_spec((H, G))],
        out_specs=pl.BlockSpec((1, B, H), lambda t: (t, 0, 0)),
        out_shape=jax.ShapeDtypeStruct((T, B, H), jnp.float32),
        scratch_shapes=[pltpu.VMEM((B, H), jnp.float32),
                        pltpu.VMEM((B, H), jnp.float32)],
        compiler_params=pltpu.CompilerParams(
            dimension_semantics=("arbitrary",)),
    )(gates_x, w_hh_t)


# ---------------------------------------------------------------------------
# Pallas kernel: fused decoder (attention + LSTM stack + output projection)
# grid=(decode_steps,); all loop-invariant tensors VMEM-resident.
# ---------------------------------------------------------------------------
def _make_decoder_kernel(*, B, T, A, P, Hd, nl, dim_out, K, fs, temperature,
                         sos_id, teacher):
    def kernel(*refs):
        (emb_seq_ref, p_enc_ref, enc_ref, mask_ref, att0_ref, wdec_ref,
         wc_ref, batt_ref, wvec_ref, wout_ref, bout_ref, embed_ref) = refs[:12]
        lw = refs[12:12 + 3 * nl]
        out_ref = refs[12 + 3 * nl]
        h_sc, c_sc, dec_sc, att_sc, emb_sc = refs[13 + 3 * nl:]

        s = pl.program_id(0)

        @pl.when(s == 0)
        def _init():
            h_sc[...] = jnp.zeros_like(h_sc)
            c_sc[...] = jnp.zeros_like(c_sc)
            dec_sc[...] = jnp.zeros_like(dec_sc)
            att_sc[...] = att0_ref[...]
            if not teacher:
                emb_sc[...] = jnp.broadcast_to(
                    embed_ref[sos_id:sos_id + 1, :], (B, Hd))

        # ----- location-aware attention ------------------------------------
        # location term: conv1d(prev_att) folded with the Fn->A projection
        # into wc [K, A]; implemented as K shift-FMAs over one [B,T,A] slab.
        if fs > 0:
            zpad = jnp.zeros((B, fs), jnp.float32)
            attpad = jnp.concatenate([zpad, att_sc[...], zpad], axis=1)
        else:
            attpad = att_sc[...]
        p_att = jnp.zeros((B, T, A), jnp.float32)
        for k in range(K):
            p_att = (p_att
                     + attpad[:, k:k + T][:, :, None] * wc_ref[k:k + 1, :][None])

        p_dec = jnp.dot(dec_sc[...], wdec_ref[...],
                        preferred_element_type=jnp.float32)            # [B, A]
        e = jnp.tanh(p_enc_ref[...] + p_dec[:, None, :] + p_att
                     + batt_ref[...][None])                            # [B,T,A]
        score = jnp.sum(e * wvec_ref[...][None], axis=2)               # [B, T]

        mask = mask_ref[...]
        score = jnp.where(mask > 0, score, -1e30) * temperature
        m = jnp.max(score, axis=1, keepdims=True)
        ex = jnp.exp(score - m) * mask
        aw = ex * pl.reciprocal(jnp.sum(ex, axis=1, keepdims=True), approx=True)
        att_sc[...] = aw
        ctx = jnp.sum(aw[:, :, None] * enc_ref[...], axis=1)           # [B, P]

        # ----- decoder LSTM stack ------------------------------------------
        emb = emb_seq_ref[0] if teacher else emb_sc[...]
        x = jnp.concatenate([emb, ctx], axis=1)
        for n in range(nl):
            wih_ref, whh_ref, b_ref = lw[3 * n], lw[3 * n + 1], lw[3 * n + 2]
            gates = (jnp.dot(x, wih_ref[...], preferred_element_type=jnp.float32)
                     + jnp.dot(h_sc[n], whh_ref[...],
                               preferred_element_type=jnp.float32)
                     + b_ref[...])
            i_g = jax.nn.sigmoid(gates[:, 0 * Hd:1 * Hd])
            f_g = jax.nn.sigmoid(gates[:, 1 * Hd:2 * Hd])
            g_g = jnp.tanh(gates[:, 2 * Hd:3 * Hd])
            o_g = jax.nn.sigmoid(gates[:, 3 * Hd:4 * Hd])
            c_new = f_g * c_sc[n] + i_g * g_g
            h_new = o_g * jnp.tanh(c_new)
            h_sc[n] = h_new
            c_sc[n] = c_new
            x = h_new
        dec_sc[...] = x

        logits = (jnp.dot(x, wout_ref[...], preferred_element_type=jnp.float32)
                  + bout_ref[...])
        out_ref[0] = logits

        if not teacher:                       # greedy feedback (labels=None)
            tok = jnp.argmax(logits, axis=1, keepdims=True)            # [B, 1]
            oh = (lax.broadcasted_iota(jnp.int32, (B, dim_out), 1)
                  == tok).astype(jnp.float32)
            emb_sc[...] = jnp.dot(oh, embed_ref[...],
                                  preferred_element_type=jnp.float32)

    return kernel


# ---------------------------------------------------------------------------
# Encoder (multi-layer BiLSTM + projection + tanh; pack_padded_sequence-
# equivalent length handling)
# ---------------------------------------------------------------------------
def _run_lstm_direction(x_seq, w_ih_t, w_hh_t, bias):
    """x_seq [B, T, Din] -> hidden states [B, T, H]."""
    B, T, Din = x_seq.shape
    H = w_hh_t.shape[0]
    # hoisted input-to-hidden matmul (one big MXU matmul per layer/direction)
    xt = jnp.transpose(x_seq, (1, 0, 2)).reshape(T * B, Din)
    gx = linear_pallas(xt, w_ih_t, bias).reshape(T, B, 4 * H)
    hs = lstm_seq_pallas(gx, w_hh_t)                                    # [T,B,H]
    return jnp.transpose(hs, (1, 0, 2))


def _reverse_within_length(x, lengths):
    # flip only the valid prefix of each sequence (packed-sequence semantics
    # for the backward LSTM direction)
    T = x.shape[1]
    t = jnp.arange(T)[None, :]
    L = lengths[:, None]
    idx = jnp.where(t < L, L - 1 - t, t)
    return jnp.take_along_axis(x, idx[:, :, None], axis=1)


def _mask_time(x, lengths):
    t = jnp.arange(x.shape[1])[None, :, None]
    return x * (t < lengths[:, None, None]).astype(x.dtype)


def encoder_forward(enc_layers, x, lengths, cfg):
    out = x.astype(jnp.float32)
    out_lengths = lengths
    sub_sample = cfg['enc_sub_sample'] or [1] * cfg['enc_num_layers']
    for n, layer in enumerate(enc_layers):
        fwd = _run_lstm_direction(out, layer['w_ih_f_t'], layer['w_hh_f_t'],
                                  layer['bias_f'])
        if cfg['enc_bidirectional']:
            rev = _reverse_within_length(out, out_lengths)
            bwd = _run_lstm_direction(rev, layer['w_ih_b_t'], layer['w_hh_b_t'],
                                      layer['bias_b'])
            bwd = _reverse_within_length(bwd, out_lengths)
            rnn_out = jnp.concatenate([fwd, bwd], axis=-1)
        else:
            rnn_out = fwd
        # pad_packed_sequence zero-fills frames beyond each utterance's length
        rnn_out = _mask_time(rnn_out, out_lengths)
        sub = sub_sample[n]
        if sub > 1:
            rnn_out = rnn_out[:, ::sub]
            out_lengths = (out_lengths + 1) // sub
        B, T, Dh = rnn_out.shape
        out = linear_pallas(rnn_out.reshape(B * T, Dh), layer['w_proj_t'],
                            layer['b_proj'], act="tanh").reshape(B, T, -1)
    return out, out_lengths


# ---------------------------------------------------------------------------
# Decoder (fused attention RNN; teacher forcing when labels given,
# greedy feedback otherwise)
# ---------------------------------------------------------------------------
def decoder_forward(dec_p, att_p, enc_out, enc_lengths, labels, cfg):
    B, T, P = enc_out.shape
    Hd = cfg['dim_dec_hid']
    nl = cfg['dec_num_layers']
    A = cfg['dim_att']
    dim_out = cfg['dim_out']
    fs = cfg['att_filter_size']
    K = att_p['wc'].shape[0]
    S = labels.shape[1] if labels is not None else T

    # encoder-side attention projection — cached once per utterance
    p_enc = linear_pallas(enc_out.reshape(B * T, P),
                          att_p['w_enc_t']).reshape(B, T, A)

    t_idx = jnp.arange(T)[None, :]
    mask = (t_idx < enc_lengths[:, None]).astype(jnp.float32)
    att0 = mask / enc_lengths[:, None].astype(jnp.float32)      # uniform init

    teacher = labels is not None
    if teacher:
        prev = jnp.concatenate(
            [jnp.full((B, 1), cfg['sos_id'], jnp.int32),
             labels[:, :-1].astype(jnp.int32)], axis=1)          # [B, S]
        emb_seq = jnp.transpose(jnp.take(dec_p['embed'], prev, axis=0),
                                (1, 0, 2))                       # [S, B, Hd]
    else:
        emb_seq = jnp.zeros((S, B, Hd), jnp.float32)

    kern = _make_decoder_kernel(
        B=B, T=T, A=A, P=P, Hd=Hd, nl=nl, dim_out=dim_out, K=K, fs=fs,
        temperature=float(cfg['att_temperature']), sos_id=int(cfg['sos_id']),
        teacher=teacher)

    args = [emb_seq, p_enc, enc_out.astype(jnp.float32), mask, att0,
            att_p['w_dec_t'], att_p['wc'], att_p['b_att'], att_p['w_vec'],
            dec_p['w_out_t'], dec_p['b_out'], dec_p['embed']]
    in_specs = [pl.BlockSpec((1, B, Hd), lambda s: (s, 0, 0)),
                _const_spec((B, T, A)), _const_spec((B, T, P)),
                _const_spec((B, T)), _const_spec((B, T)),
                _const_spec((Hd, A)), _const_spec((K, A)),
                _const_spec((1, A)), _const_spec((1, A)),
                _const_spec((Hd, dim_out)), _const_spec((1, dim_out)),
                _const_spec((dim_out, Hd))]
    for n in range(nl):
        din = (Hd + P) if n == 0 else Hd
        args += [dec_p['w_ih_t'][n], dec_p['w_hh_t'][n], dec_p['bias'][n]]
        in_specs += [_const_spec((din, 4 * Hd)), _const_spec((Hd, 4 * Hd)),
                     _const_spec((1, 4 * Hd))]

    logits = pl.pallas_call(
        kern,
        grid=(S,),
        in_specs=in_specs,
        out_specs=pl.BlockSpec((1, B, dim_out), lambda s: (s, 0, 0)),
        out_shape=jax.ShapeDtypeStruct((S, B, dim_out), jnp.float32),
        scratch_shapes=[pltpu.VMEM((nl, B, Hd), jnp.float32),   # h
                        pltpu.VMEM((nl, B, Hd), jnp.float32),   # c
                        pltpu.VMEM((B, Hd), jnp.float32),       # prev dec out
                        pltpu.VMEM((B, T), jnp.float32),        # prev att w
                        pltpu.VMEM((B, Hd), jnp.float32)],      # prev emb
        compiler_params=pltpu.CompilerParams(
            dimension_semantics=("arbitrary",)),
    )(*args)
    return jnp.transpose(logits, (1, 0, 2))                     # [B, S, dim_out]


def e2e_forward(params, input_sequence, input_lengths, label_sequence, cfg):
    enc_out, enc_lengths = encoder_forward(params['encoder'], input_sequence,
                                           input_lengths, cfg)
    dec_out = decoder_forward(params['decoder'], params['attention'], enc_out,
                              enc_lengths, label_sequence, cfg)
    return dec_out, enc_lengths


# ---------------------------------------------------------------------------
# deterministic LeCun-style initialization (weights ~ N(0, 1/fan_in), biases 0)
# kept in the PyTorch [out, in] layout; prepare_params() transposes once.
# ---------------------------------------------------------------------------
def _lecun(key, shape, fan_in):
    return jax.random.normal(key, shape, jnp.float32) / np.sqrt(fan_in)


def init_params(key, cfg):
    keys = iter(jax.random.split(key, 64))
    H, P = cfg['dim_enc_hid'], cfg['dim_enc_proj']
    ndir = 2 if cfg['enc_bidirectional'] else 1

    enc_layers = []
    for n in range(cfg['enc_num_layers']):
        din = cfg['dim_in'] if n == 0 else P
        layer = {}
        for d in (['f', 'b'] if cfg['enc_bidirectional'] else ['f']):
            layer['w_ih_' + d] = _lecun(next(keys), (4 * H, din), din)
            layer['w_hh_' + d] = _lecun(next(keys), (4 * H, H), H)
            layer['b_ih_' + d] = jnp.zeros((4 * H,), jnp.float32)
            layer['b_hh_' + d] = jnp.zeros((4 * H,), jnp.float32)
        layer['w_proj'] = _lecun(next(keys), (P, ndir * H), ndir * H)
        layer['b_proj'] = jnp.zeros((P,), jnp.float32)
        enc_layers.append(layer)

    Hd, A = cfg['dim_dec_hid'], cfg['dim_att']
    Fn, K = cfg['att_filter_num'], 2 * cfg['att_filter_size'] + 1
    dec = {'embed': _lecun(next(keys), (cfg['dim_out'], Hd), Hd),
           'w_ih': [], 'w_hh': [], 'b_ih': [], 'b_hh': []}
    for n in range(cfg['dec_num_layers']):
        din = (P + Hd) if n == 0 else Hd
        dec['w_ih'].append(_lecun(next(keys), (4 * Hd, din), din))
        dec['w_hh'].append(_lecun(next(keys), (4 * Hd, Hd), Hd))
        dec['b_ih'].append(jnp.zeros((4 * Hd,), jnp.float32))
        dec['b_hh'].append(jnp.zeros((4 * Hd,), jnp.float32))
    dec['w_out'] = _lecun(next(keys), (cfg['dim_out'], Hd), Hd)
    dec['b_out'] = jnp.zeros((cfg['dim_out'],), jnp.float32)

    att = {'conv_w': _lecun(next(keys), (Fn, K), 1 * K),   # nn.Conv1d(1, Fn, K) weight
           'w_dec': _lecun(next(keys), (A, Hd), Hd),       # dec_proj (bias=False)
           'w_enc': _lecun(next(keys), (A, P), P),         # enc_proj (bias=False)
           'w_att': _lecun(next(keys), (A, Fn), Fn),       # att_proj (bias=True)
           'b_att': jnp.zeros((A,), jnp.float32),
           'w_vec': _lecun(next(keys), (1, A), A)}         # w (bias=False)

    return {'encoder': enc_layers, 'decoder': dec, 'attention': att}


def prepare_params(raw, cfg):
    """One-time parameter prep: transpose to [in, out], fuse biases, fold the
    location conv with the attention projection.  Runs outside jit."""
    f32 = jnp.float32
    enc = []
    for layer in raw['encoder']:
        pl_layer = {}
        for d in (['f', 'b'] if cfg['enc_bidirectional'] else ['f']):
            pl_layer['w_ih_%s_t' % d] = layer['w_ih_' + d].T.astype(f32)
            pl_layer['w_hh_%s_t' % d] = layer['w_hh_' + d].T.astype(f32)
            pl_layer['bias_' + d] = (layer['b_ih_' + d]
                                     + layer['b_hh_' + d]).reshape(1, -1).astype(f32)
        pl_layer['w_proj_t'] = layer['w_proj'].T.astype(f32)
        pl_layer['b_proj'] = layer['b_proj'].reshape(1, -1).astype(f32)
        enc.append(pl_layer)

    rd = raw['decoder']
    dec = {'embed': rd['embed'].astype(f32),
           'w_ih_t': [w.T.astype(f32) for w in rd['w_ih']],
           'w_hh_t': [w.T.astype(f32) for w in rd['w_hh']],
           'bias': [(bi + bh).reshape(1, -1).astype(f32)
                    for bi, bh in zip(rd['b_ih'], rd['b_hh'])],
           'w_out_t': rd['w_out'].T.astype(f32),
           'b_out': rd['b_out'].reshape(1, -1).astype(f32)}

    ra = raw['attention']
    att = {'w_enc_t': ra['w_enc'].T.astype(f32),                  # [P, A]
           'w_dec_t': ra['w_dec'].T.astype(f32),                  # [Hd, A]
           'wc': (ra['conv_w'].T @ ra['w_att'].T).astype(f32),    # [K, A]
           'b_att': ra['b_att'].reshape(1, -1).astype(f32),       # [1, A]
           'w_vec': ra['w_vec'].reshape(1, -1).astype(f32)}       # [1, A]

    return {'encoder': enc, 'decoder': dec, 'attention': att}


# ---------------------------------------------------------------------------
# main
# ---------------------------------------------------------------------------
if __name__ == "__main__":
    cfg = dict(
        dim_in=16, dim_enc_hid=32, dim_enc_proj=32, dim_dec_hid=32,
        dim_out=10, dim_att=32, att_filter_size=2, att_filter_num=4,
        sos_id=1, att_temperature=1.0, enc_num_layers=2, dec_num_layers=2,
        enc_bidirectional=True, enc_sub_sample=None, enc_rnn_type='LSTM')

    key = jax.random.PRNGKey(0)
    kp, kx, kl = jax.random.split(key, 3)
    raw_params = init_params(kp, cfg)
    params = prepare_params(raw_params, cfg)   # one-time prep, outside jit

    B, Tin, Tout = 2, 16, 8
    x = jax.random.normal(kx, (B, Tin, cfg['dim_in']), jnp.float32)
    lengths = jnp.array([16, 12], jnp.int32)
    labels = jax.random.randint(kl, (B, Tout), 2, cfg['dim_out'], jnp.int32)

    fwd = jax.jit(functools.partial(e2e_forward, cfg=cfg))
    dec_out, enc_lengths = fwd(params, x, lengths, labels)
    jax.block_until_ready((dec_out, enc_lengths))

    assert dec_out.shape == (B, Tout, cfg['dim_out'])
    assert enc_lengths.shape == (B,)
    assert bool(jnp.all(jnp.isfinite(dec_out)))
    print("KERNEL_OK")
</pallas_src>

<mosaic_0001>
module attributes {stable_mosaic.version = 11 : i64} {
  func.func @_linear_kernel(%arg0: i32, %arg1: memref<32x16xf32, #tpu.memory_space<vmem>>, %arg2: memref<16x128xf32, #tpu.memory_space<vmem>>, %arg3: memref<1x128xf32, #tpu.memory_space<vmem>>, %arg4: memref<32x128xf32, #tpu.memory_space<vmem>>) attributes {dimension_semantics = [#tpu.dimension_semantics<parallel>], iteration_bounds = array<i64: 1>, scalar_prefetch = 0 : i64, scratch_operands = 0 : i64, tpu.core_type = #tpu.core_type<tc>, window_params = [{transform_indices = @transform_0, window_bounds = array<i64: 32, 16>}, {pipeline_mode = #tpu.pipeline_mode<synchronous>, transform_indices = @transform_1, window_bounds = array<i64: 16, 128>}, {pipeline_mode = #tpu.pipeline_mode<synchronous>, transform_indices = @transform_2, window_bounds = array<i64: 1, 128>}, {transform_indices = @transform_3, window_bounds = array<i64: 32, 128>}]} {
    %c0 = arith.constant 0 : index
    %c0_0 = arith.constant 0 : index
    %0 = vector.load %arg1[%c0, %c0_0] : memref<32x16xf32, #tpu.memory_space<vmem>>, vector<32x16xf32>
    %c0_1 = arith.constant 0 : index
    %c0_2 = arith.constant 0 : index
    %1 = vector.load %arg2[%c0_1, %c0_2] : memref<16x128xf32, #tpu.memory_space<vmem>>, vector<16x128xf32>
    %cst = arith.constant dense<0.000000e+00> : vector<32x128xf32>
    %2 = tpu.matmul %0, %1, %cst {dimension_numbers = #tpu.dot_dimension_numbers<[1], [0], [0], [1], [0, 0, 1, 1], [], []>} : vector<32x16xf32>, vector<16x128xf32>, vector<32x128xf32> -> vector<32x128xf32>
    %c0_3 = arith.constant 0 : index
    %c0_4 = arith.constant 0 : index
    %3 = vector.load %arg3[%c0_3, %c0_4] : memref<1x128xf32, #tpu.memory_space<vmem>>, vector<1x128xf32>
    %4 = vector.broadcast %3 : vector<1x128xf32> to vector<32x128xf32>
    %5 = arith.addf %2, %4 : vector<32x128xf32>
    %c0_5 = arith.constant 0 : index
    %c0_6 = arith.constant 0 : index
    %6 = vector.load %arg4[%c0_5, %c0_6] : memref<32x128xf32, #tpu.memory_space<vmem>>, vector<32x128xf32>
    tpu.vector_store %arg4[%c0_5, %c0_6], %5 {strides = array<i32>} : memref<32x128xf32, #tpu.memory_space<vmem>>, vector<32x128xf32>,
    return
  }
  func.func @transform_0(%arg0: i32) -> (i32, i32) {
    %c0_i32 = arith.constant 0 : i32
    %c0_i32_0 = arith.constant 0 : i32
    return %arg0, %c0_i32 : i32, i32
  }
  func.func @transform_1(%arg0: i32) -> (i32, i32) {
    %c0_i32 = arith.constant 0 : i32
    %c0_i32_0 = arith.constant 0 : i32
    %c0_i32_1 = arith.constant 0 : i32
    return %c0_i32, %c0_i32_0 : i32, i32
  }
  func.func @transform_2(%arg0: i32) -> (i32, i32) {
    %c0_i32 = arith.constant 0 : i32
    %c0_i32_0 = arith.constant 0 : i32
    %c0_i32_1 = arith.constant 0 : i32
    return %c0_i32, %c0_i32_0 : i32, i32
  }
  func.func @transform_3(%arg0: i32) -> (i32, i32) {
    %c0_i32 = arith.constant 0 : i32
    %c0_i32_0 = arith.constant 0 : i32
    return %arg0, %c0_i32 : i32, i32
  }
}

module attributes {stable_mosaic.version = 11 : i64} {
  func.func @_lstm_seq_kernel(%arg0: i32, %arg1: memref<1x2x128xf32, #tpu.memory_space<vmem>>, %arg2: memref<32x128xf32, #tpu.memory_space<vmem>>, %arg3: memref<1x2x32xf32, #tpu.memory_space<vmem>>, %arg4: memref<2x32xf32, #tpu.memory_space<vmem>>, %arg5: memref<2x32xf32, #tpu.memory_space<vmem>>) attributes {dimension_semantics = [#tpu.dimension_semantics<arbitrary>], iteration_bounds = array<i64: 16>, scalar_prefetch = 0 : i64, scratch_operands = 2 : i64, tpu.core_type = #tpu.core_type<tc>, window_params = [{transform_indices = @transform_0, window_bounds = array<i64: 1, 2, 128>}, {pipeline_mode = #tpu.pipeline_mode<synchronous>, transform_indices = @transform_1, window_bounds = array<i64: 32, 128>}, {transform_indices = @transform_2, window_bounds = array<i64: 1, 2, 32>}]} {
    %c0_i32 = arith.constant 0 : i32
    %0 = arith.cmpi eq, %arg0, %c0_i32 : i32
    %1 = arith.extui %0 : i1 to i32
    %c0_i32_0 = arith.constant 0 : i32
    %2 = arith.cmpi ne, %1, %c0_i32_0 : i32
    scf.if %2 {
      %cst_19 = arith.constant 0.000000e+00 : f32
      %40 = vector.broadcast %cst_19 : f32 to vector<2x32xf32>
      %c0_20 = arith.constant 0 : index
      %c0_21 = arith.constant 0 : index
      %41 = vector.load %arg4[%c0_20, %c0_21] : memref<2x32xf32, #tpu.memory_space<vmem>>, vector<2x32xf32>
      tpu.vector_store %arg4[%c0_20, %c0_21], %40 {strides = array<i32>} : memref<2x32xf32, #tpu.memory_space<vmem>>, vector<2x32xf32>,
      %cst_22 = arith.constant 0.000000e+00 : f32
      %42 = vector.broadcast %cst_22 : f32 to vector<2x32xf32>
      %c0_23 = arith.constant 0 : index
      %c0_24 = arith.constant 0 : index
      %43 = vector.load %arg5[%c0_23, %c0_24] : memref<2x32xf32, #tpu.memory_space<vmem>>, vector<2x32xf32>
      tpu.vector_store %arg5[%c0_23, %c0_24], %42 {strides = array<i32>} : memref<2x32xf32, #tpu.memory_space<vmem>>, vector<2x32xf32>,
    } else {
    }
    %c0 = arith.constant 0 : index
    %c0_1 = arith.constant 0 : index
    %c0_2 = arith.constant 0 : index
    %3 = vector.load %arg1[%c0, %c0_1, %c0_2] : memref<1x2x128xf32, #tpu.memory_space<vmem>>, vector<1x2x128xf32>
    %4 = vector.shape_cast %3 : vector<1x2x128xf32> to vector<2x128xf32>
    %c0_3 = arith.constant 0 : index
    %c0_4 = arith.constant 0 : index
    %5 = vector.load %arg4[%c0_3, %c0_4] : memref<2x32xf32, #tpu.memory_space<vmem>>, vector<2x32xf32>
    %c0_5 = arith.constant 0 : index
    %c0_6 = arith.constant 0 : index
    %6 = vector.load %arg2[%c0_5, %c0_6] : memref<32x128xf32, #tpu.memory_space<vmem>>, vector<32x128xf32>
    %cst = arith.constant dense<0.000000e+00> : vector<2x128xf32>
    %7 = tpu.matmul %5, %6, %cst {dimension_numbers = #tpu.dot_dimension_numbers<[1], [0], [0], [1], [0, 0, 1, 1], [], []>} : vector<2x32xf32>, vector<32x128xf32>, vector<2x128xf32> -> vector<2x128xf32>
    %8 = arith.addf %4, %7 : vector<2x128xf32>
    %9 = vector.extract_strided_slice %8 {offsets = [0, 0], sizes = [2, 32], strides = [1, 1]} : vector<2x128xf32> to vector<2x32xf32>
    %10 = arith.negf %9 : vector<2x32xf32>
    %11 = math.exp %10 : vector<2x32xf32>
    %cst_7 = arith.constant 1.000000e+00 : f32
    %12 = vector.broadcast %cst_7 : f32 to vector<2x32xf32>
    %13 = arith.addf %12, %11 : vector<2x32xf32>
    %14 = arith.divf %12, %13 : vector<2x32xf32>
    %15 = vector.extract_strided_slice %8 {offsets = [0, 32], sizes = [2, 32], strides = [1, 1]} : vector<2x128xf32> to vector<2x32xf32>
    %16 = arith.negf %15 : vector<2x32xf32>
    %17 = math.exp %16 : vector<2x32xf32>
    %cst_8 = arith.constant 1.000000e+00 : f32
    %18 = vector.broadcast %cst_8 : f32 to vector<2x32xf32>
    %19 = arith.addf %18, %17 : vector<2x32xf32>
    %20 = arith.divf %18, %19 : vector<2x32xf32>
    %21 = vector.extract_strided_slice %8 {offsets = [0, 64], sizes = [2, 32], strides = [1, 1]} : vector<2x128xf32> to vector<2x32xf32>
    %22 = math.tanh %21 : vector<2x32xf32>
    %23 = vector.extract_strided_slice %8 {offsets = [0, 96], sizes = [2, 32], strides = [1, 1]} : vector<2x128xf32> to vector<2x32xf32>
    %24 = arith.negf %23 : vector<2x32xf32>
    %25 = math.exp %24 : vector<2x32xf32>
    %cst_9 = arith.constant 1.000000e+00 : f32
    %26 = vector.broadcast %cst_9 : f32 to vector<2x32xf32>
    %27 = arith.addf %26, %25 : vector<2x32xf32>
    %28 = arith.divf %26, %27 : vector<2x32xf32>
    %c0_10 = arith.constant 0 : index
    %c0_11 = arith.constant 0 : index
    %29 = vector.load %arg5[%c0_10, %c0_11] : memref<2x32xf32, #tpu.memory_space<vmem>>, vector<2x32xf32>
    %30 = arith.mulf %20, %29 : vector<2x32xf32>
    %31 = arith.mulf %14, %22 : vector<2x32xf32>
    %32 = arith.addf %30, %31 : vector<2x32xf32>
    %33 = math.tanh %32 : vector<2x32xf32>
    %34 = arith.mulf %28, %33 : vector<2x32xf32>
    %c0_12 = arith.constant 0 : index
    %c0_13 = arith.constant 0 : index
    %35 = vector.load %arg4[%c0_12, %c0_13] : memref<2x32xf32, #tpu.memory_space<vmem>>, vector<2x32xf32>
    tpu.vector_store %arg4[%c0_12, %c0_13], %34 {strides = array<i32>} : memref<2x32xf32, #tpu.memory_space<vmem>>, vector<2x32xf32>,
    %c0_14 = arith.constant 0 : index
    %c0_15 = arith.constant 0 : index
    %36 = vector.load %arg5[%c0_14, %c0_15] : memref<2x32xf32, #tpu.memory_space<vmem>>, vector<2x32xf32>
    tpu.vector_store %arg5[%c0_14, %c0_15], %32 {strides = array<i32>} : memref<2x32xf32, #tpu.memory_space<vmem>>, vector<2x32xf32>,
    %c0_16 = arith.constant 0 : index
    %c0_17 = arith.constant 0 : index
    %c0_18 = arith.constant 0 : index
    %37 = vector.load %arg3[%c0_16, %c0_17, %c0_18] : memref<1x2x32xf32, #tpu.memory_space<vmem>>, vector<1x2x32xf32>
    %38 = vector.shape_cast %37 : vector<1x2x32xf32> to vector<2x32xf32>
    %39 = vector.shape_cast %34 : vector<2x32xf32> to vector<1x2x32xf32>
    tpu.vector_store %arg3[%c0_16, %c0_17, %c0_18], %39 {strides = array<i32>} : memref<1x2x32xf32, #tpu.memory_space<vmem>>, vector<1x2x32xf32>,
    return
  }
  func.func @transform_0(%arg0: i32) -> (i32, i32, i32) {
    %c0_i32 = arith.constant 0 : i32
    %c0_i32_0 = arith.constant 0 : i32
    %c0_i32_1 = arith.constant 0 : i32
    return %arg0, %c0_i32, %c0_i32_0 : i32, i32, i32
  }
  func.func @transform_1(%arg0: i32) -> (i32, i32) {
    %c0_i32 = arith.constant 0 : i32
    %c0_i32_0 = arith.constant 0 : i32
    %c0_i32_1 = arith.constant 0 : i32
    return %c0_i32, %c0_i32_0 : i32, i32
  }
  func.func @transform_2(%arg0: i32) -> (i32, i32, i32) {
    %c0_i32 = arith.constant 0 : i32
    %c0_i32_0 = arith.constant 0 : i32
    %c0_i32_1 = arith.constant 0 : i32
    return %arg0, %c0_i32, %c0_i32_0 : i32, i32, i32
  }
}

module attributes {stable_mosaic.version = 11 : i64} {
  func.func @_linear_kernel(%arg0: i32, %arg1: memref<32x64xf32, #tpu.memory_space<vmem>>, %arg2: memref<64x32xf32, #tpu.memory_space<vmem>>, %arg3: memref<1x32xf32, #tpu.memory_space<vmem>>, %arg4: memref<32x32xf32, #tpu.memory_space<vmem>>) attributes {dimension_semantics = [#tpu.dimension_semantics<parallel>], iteration_bounds = array<i64: 1>, scalar_prefetch = 0 : i64, scratch_operands = 0 : i64, tpu.core_type = #tpu.core_type<tc>, window_params = [{transform_indices = @transform_0, window_bounds = array<i64: 32, 64>}, {pipeline_mode = #tpu.pipeline_mode<synchronous>, transform_indices = @transform_1, window_bounds = array<i64: 64, 32>}, {pipeline_mode = #tpu.pipeline_mode<synchronous>, transform_indices = @transform_2, window_bounds = array<i64: 1, 32>}, {transform_indices = @transform_3, window_bounds = array<i64: 32, 32>}]} {
    %c0 = arith.constant 0 : index
    %c0_0 = arith.constant 0 : index
    %0 = vector.load %arg1[%c0, %c0_0] : memref<32x64xf32, #tpu.memory_space<vmem>>, vector<32x64xf32>
    %c0_1 = arith.constant 0 : index
    %c0_2 = arith.constant 0 : index
    %1 = vector.load %arg2[%c0_1, %c0_2] : memref<64x32xf32, #tpu.memory_space<vmem>>, vector<64x32xf32>
    %cst = arith.constant dense<0.000000e+00> : vector<32x32xf32>
    %2 = tpu.matmul %0, %1, %cst {dimension_numbers = #tpu.dot_dimension_numbers<[1], [0], [0], [1], [0, 0, 1, 1], [], []>} : vector<32x64xf32>, vector<64x32xf32>, vector<32x32xf32> -> vector<32x32xf32>
    %c0_3 = arith.constant 0 : index
    %c0_4 = arith.constant 0 : index
    %3 = vector.load %arg3[%c0_3, %c0_4] : memref<1x32xf32, #tpu.memory_space<vmem>>, vector<1x32xf32>
    %4 = vector.broadcast %3 : vector<1x32xf32> to vector<32x32xf32>
    %5 = arith.addf %2, %4 : vector<32x32xf32>
    %6 = math.tanh %5 : vector<32x32xf32>
    %c0_5 = arith.constant 0 : index
    %c0_6 = arith.constant 0 : index
    %7 = vector.load %arg4[%c0_5, %c0_6] : memref<32x32xf32, #tpu.memory_space<vmem>>, vector<32x32xf32>
    tpu.vector_store %arg4[%c0_5, %c0_6], %6 {strides = array<i32>} : memref<32x32xf32, #tpu.memory_space<vmem>>, vector<32x32xf32>,
    return
  }
  func.func @transform_0(%arg0: i32) -> (i32, i32) {
    %c0_i32 = arith.constant 0 : i32
    %c0_i32_0 = arith.constant 0 : i32
    return %arg0, %c0_i32 : i32, i32
  }
  func.func @transform_1(%arg0: i32) -> (i32, i32) {
    %c0_i32 = arith.constant 0 : i32
    %c0_i32_0 = arith.constant 0 : i32
    %c0_i32_1 = arith.constant 0 : i32
    return %c0_i32, %c0_i32_0 : i32, i32
  }
  func.func @transform_2(%arg0: i32) -> (i32, i32) {
    %c0_i32 = arith.constant 0 : i32
    %c0_i32_0 = arith.constant 0 : i32
    %c0_i32_1 = arith.constant 0 : i32
    return %c0_i32, %c0_i32_0 : i32, i32
  }
  func.func @transform_3(%arg0: i32) -> (i32, i32) {
    %c0_i32 = arith.constant 0 : i32
    %c0_i32_0 = arith.constant 0 : i32
    return %arg0, %c0_i32 : i32, i32
  }
}

module attributes {stable_mosaic.version = 11 : i64} {
  func.func @_linear_kernel(%arg0: i32, %arg1: memref<32x32xf32, #tpu.memory_space<vmem>>, %arg2: memref<32x128xf32, #tpu.memory_space<vmem>>, %arg3: memref<1x128xf32, #tpu.memory_space<vmem>>, %arg4: memref<32x128xf32, #tpu.memory_space<vmem>>) attributes {dimension_semantics = [#tpu.dimension_semantics<parallel>], iteration_bounds = array<i64: 1>, scalar_prefetch = 0 : i64, scratch_operands = 0 : i64, tpu.core_type = #tpu.core_type<tc>, window_params = [{transform_indices = @transform_0, window_bounds = array<i64: 32, 32>}, {pipeline_mode = #tpu.pipeline_mode<synchronous>, transform_indices = @transform_1, window_bounds = array<i64: 32, 128>}, {pipeline_mode = #tpu.pipeline_mode<synchronous>, transform_indices = @transform_2, window_bounds = array<i64: 1, 128>}, {transform_indices = @transform_3, window_bounds = array<i64: 32, 128>}]} {
    %c0 = arith.constant 0 : index
    %c0_0 = arith.constant 0 : index
    %0 = vector.load %arg1[%c0, %c0_0] : memref<32x32xf32, #tpu.memory_space<vmem>>, vector<32x32xf32>
    %c0_1 = arith.constant 0 : index
    %c0_2 = arith.constant 0 : index
    %1 = vector.load %arg2[%c0_1, %c0_2] : memref<32x128xf32, #tpu.memory_space<vmem>>, vector<32x128xf32>
    %cst = arith.constant dense<0.000000e+00> : vector<32x128xf32>
    %2 = tpu.matmul %0, %1, %cst {dimension_numbers = #tpu.dot_dimension_numbers<[1], [0], [0], [1], [0, 0, 1, 1], [], []>} : vector<32x32xf32>, vector<32x128xf32>, vector<32x128xf32> -> vector<32x128xf32>
    %c0_3 = arith.constant 0 : index
    %c0_4 = arith.constant 0 : index
    %3 = vector.load %arg3[%c0_3, %c0_4] : memref<1x128xf32, #tpu.memory_space<vmem>>, vector<1x128xf32>
    %4 = vector.broadcast %3 : vector<1x128xf32> to vector<32x128xf32>
    %5 = arith.addf %2, %4 : vector<32x128xf32>
    %c0_5 = arith.constant 0 : index
    %c0_6 = arith.constant 0 : index
    %6 = vector.load %arg4[%c0_5, %c0_6] : memref<32x128xf32, #tpu.memory_space<vmem>>, vector<32x128xf32>
    tpu.vector_store %arg4[%c0_5, %c0_6], %5 {strides = array<i32>} : memref<32x128xf32, #tpu.memory_space<vmem>>, vector<32x128xf32>,
    return
  }
  func.func @transform_0(%arg0: i32) -> (i32, i32) {
    %c0_i32 = arith.constant 0 : i32
    %c0_i32_0 = arith.constant 0 : i32
    return %arg0, %c0_i32 : i32, i32
  }
  func.func @transform_1(%arg0: i32) -> (i32, i32) {
    %c0_i32 = arith.constant 0 : i32
    %c0_i32_0 = arith.constant 0 : i32
    %c0_i32_1 = arith.constant 0 : i32
    return %c0_i32, %c0_i32_0 : i32, i32
  }
  func.func @transform_2(%arg0: i32) -> (i32, i32) {
    %c0_i32 = arith.constant 0 : i32
    %c0_i32_0 = arith.constant 0 : i32
    %c0_i32_1 = arith.constant 0 : i32
    return %c0_i32, %c0_i32_0 : i32, i32
  }
  func.func @transform_3(%arg0: i32) -> (i32, i32) {
    %c0_i32 = arith.constant 0 : i32
    %c0_i32_0 = arith.constant 0 : i32
    return %arg0, %c0_i32 : i32, i32
  }
}

module attributes {stable_mosaic.version = 11 : i64} {
  func.func @_linear_kernel(%arg0: i32, %arg1: memref<32x32xf32, #tpu.memory_space<vmem>>, %arg2: memref<32x32xf32, #tpu.memory_space<vmem>>, %arg3: memref<1x32xf32, #tpu.memory_space<vmem>>, %arg4: memref<32x32xf32, #tpu.memory_space<vmem>>) attributes {dimension_semantics = [#tpu.dimension_semantics<parallel>], iteration_bounds = array<i64: 1>, scalar_prefetch = 0 : i64, scratch_operands = 0 : i64, tpu.core_type = #tpu.core_type<tc>, window_params = [{transform_indices = @transform_0, window_bounds = array<i64: 32, 32>}, {pipeline_mode = #tpu.pipeline_mode<synchronous>, transform_indices = @transform_1, window_bounds = array<i64: 32, 32>}, {pipeline_mode = #tpu.pipeline_mode<synchronous>, transform_indices = @transform_2, window_bounds = array<i64: 1, 32>}, {transform_indices = @transform_3, window_bounds = array<i64: 32, 32>}]} {
    %c0 = arith.constant 0 : index
    %c0_0 = arith.constant 0 : index
    %0 = vector.load %arg1[%c0, %c0_0] : memref<32x32xf32, #tpu.memory_space<vmem>>, vector<32x32xf32>
    %c0_1 = arith.constant 0 : index
    %c0_2 = arith.constant 0 : index
    %1 = vector.load %arg2[%c0_1, %c0_2] : memref<32x32xf32, #tpu.memory_space<vmem>>, vector<32x32xf32>
    %cst = arith.constant dense<0.000000e+00> : vector<32x32xf32>
    %2 = tpu.matmul %0, %1, %cst {dimension_numbers = #tpu.dot_dimension_numbers<[1], [0], [0], [1], [0, 0, 1, 1], [], []>} : vector<32x32xf32>, vector<32x32xf32>, vector<32x32xf32> -> vector<32x32xf32>
    %c0_3 = arith.constant 0 : index
    %c0_4 = arith.constant 0 : index
    %3 = vector.load %arg3[%c0_3, %c0_4] : memref<1x32xf32, #tpu.memory_space<vmem>>, vector<1x32xf32>
    %4 = vector.broadcast %3 : vector<1x32xf32> to vector<32x32xf32>
    %5 = arith.addf %2, %4 : vector<32x32xf32>
    %c0_5 = arith.constant 0 : index
    %c0_6 = arith.constant 0 : index
    %6 = vector.load %arg4[%c0_5, %c0_6] : memref<32x32xf32, #tpu.memory_space<vmem>>, vector<32x32xf32>
    tpu.vector_store %arg4[%c0_5, %c0_6], %5 {strides = array<i32>} : memref<32x32xf32, #tpu.memory_space<vmem>>, vector<32x32xf32>,
    return
  }
  func.func @transform_0(%arg0: i32) -> (i32, i32) {
    %c0_i32 = arith.constant 0 : i32
    %c0_i32_0 = arith.constant 0 : i32
    return %arg0, %c0_i32 : i32, i32
  }
  func.func @transform_1(%arg0: i32) -> (i32, i32) {
    %c0_i32 = arith.constant 0 : i32
    %c0_i32_0 = arith.constant 0 : i32
    %c0_i32_1 = arith.constant 0 : i32
    return %c0_i32, %c0_i32_0 : i32, i32
  }
  func.func @transform_2(%arg0: i32) -> (i32, i32) {
    %c0_i32 = arith.constant 0 : i32
    %c0_i32_0 = arith.constant 0 : i32
    %c0_i32_1 = arith.constant 0 : i32
    return %c0_i32, %c0_i32_0 : i32, i32
  }
  func.func @transform_3(%arg0: i32) -> (i32, i32) {
    %c0_i32 = arith.constant 0 : i32
    %c0_i32_0 = arith.constant 0 : i32
    return %arg0, %c0_i32 : i32, i32
  }
}

module attributes {stable_mosaic.version = 11 : i64} {
  func.func @kernel(%arg0: i32, %arg1: memref<1x2x32xf32, #tpu.memory_space<vmem>>, %arg2: memref<2x16x32xf32, #tpu.memory_space<vmem>>, %arg3: memref<2x16x32xf32, #tpu.memory_space<vmem>>, %arg4: memref<2x16xf32, #tpu.memory_space<vmem>>, %arg5: memref<2x16xf32, #tpu.memory_space<vmem>>, %arg6: memref<32x32xf32, #tpu.memory_space<vmem>>, %arg7: memref<5x32xf32, #tpu.memory_space<vmem>>, %arg8: memref<1x32xf32, #tpu.memory_space<vmem>>, %arg9: memref<1x32xf32, #tpu.memory_space<vmem>>, %arg10: memref<32x10xf32, #tpu.memory_space<vmem>>, %arg11: memref<1x10xf32, #tpu.memory_space<vmem>>, %arg12: memref<10x32xf32, #tpu.memory_space<vmem>>, %arg13: memref<64x128xf32, #tpu.memory_space<vmem>>, %arg14: memref<32x128xf32, #tpu.memory_space<vmem>>, %arg15: memref<1x128xf32, #tpu.memory_space<vmem>>, %arg16: memref<32x128xf32, #tpu.memory_space<vmem>>, %arg17: memref<32x128xf32, #tpu.memory_space<vmem>>, %arg18: memref<1x128xf32, #tpu.memory_space<vmem>>, %arg19: memref<1x2x10xf32, #tpu.memory_space<vmem>>, %arg20: memref<2x2x32xf32, #tpu.memory_space<vmem>>, %arg21: memref<2x2x32xf32, #tpu.memory_space<vmem>>, %arg22: memref<2x32xf32, #tpu.memory_space<vmem>>, %arg23: memref<2x16xf32, #tpu.memory_space<vmem>>, %arg24: memref<2x32xf32, #tpu.memory_space<vmem>>) attributes {dimension_semantics = [#tpu.dimension_semantics<arbitrary>], iteration_bounds = array<i64: 8>, scalar_prefetch = 0 : i64, scratch_operands = 5 : i64, tpu.core_type = #tpu.core_type<tc>, window_params = [{transform_indices = @transform_0, window_bounds = array<i64: 1, 2, 32>}, {pipeline_mode = #tpu.pipeline_mode<synchronous>, transform_indices = @transform_1, window_bounds = array<i64: 2, 16, 32>}, {pipeline_mode = #tpu.pipeline_mode<synchronous>, transform_indices = @transform_2, window_bounds = array<i64: 2, 16, 32>}, {pipeline_mode = #tpu.pipeline_mode<synchronous>, transform_indices = @transform_3, window_bounds = array<i64: 2, 16>}, {pipeline_mode = #tpu.pipeline_mode<synchronous>, transform_indices = @transform_4, window_bounds = array<i64: 2, 16>}, {pipeline_mode = #tpu.pipeline_mode<synchronous>, transform_indices = @transform_5, window_bounds = array<i64: 32, 32>}, {pipeline_mode = #tpu.pipeline_mode<synchronous>, transform_indices = @transform_6, window_bounds = array<i64: 5, 32>}, {pipeline_mode = #tpu.pipeline_mode<synchronous>, transform_indices = @transform_7, window_bounds = array<i64: 1, 32>}, {pipeline_mode = #tpu.pipeline_mode<synchronous>, transform_indices = @transform_8, window_bounds = array<i64: 1, 32>}, {pipeline_mode = #tpu.pipeline_mode<synchronous>, transform_indices = @transform_9, window_bounds = array<i64: 32, 10>}, {pipeline_mode = #tpu.pipeline_mode<synchronous>, transform_indices = @transform_10, window_bounds = array<i64: 1, 10>}, {pipeline_mode = #tpu.pipeline_mode<synchronous>, transform_indices = @transform_11, window_bounds = array<i64: 10, 32>}, {pipeline_mode = #tpu.pipeline_mode<synchronous>, transform_indices = @transform_12, window_bounds = array<i64: 64, 128>}, {pipeline_mode = #tpu.pipeline_mode<synchronous>, transform_indices = @transform_13, window_bounds = array<i64: 32, 128>}, {pipeline_mode = #tpu.pipeline_mode<synchronous>, transform_indices = @transform_14, window_bounds = array<i64: 1, 128>}, {pipeline_mode = #tpu.pipeline_mode<synchronous>, transform_indices = @transform_15, window_bounds = array<i64: 32, 128>}, {pipeline_mode = #tpu.pipeline_mode<synchronous>, transform_indices = @transform_16, window_bounds = array<i64: 32, 128>}, {pipeline_mode = #tpu.pipeline_mode<synchronous>, transform_indices = @transform_17, window_bounds = array<i64: 1, 128>}, {transform_indices = @transform_18, window_bounds = array<i64: 1, 2, 10>}]} {
    %c0_i32 = arith.constant 0 : i32
    %0 = arith.cmpi eq, %arg0, %c0_i32 : i32
    %1 = arith.extui %0 : i1 to i32
    %c0_i32_0 = arith.constant 0 : i32
    %2 = arith.cmpi ne, %1, %c0_i32_0 : i32
    scf.if %2 {
      %cst_94 = arith.constant 0.000000e+00 : f32
      %187 = vector.broadcast %cst_94 : f32 to vector<2x2x32xf32>
      %c0_95 = arith.constant 0 : index
      %c0_96 = arith.constant 0 : index
      %c0_97 = arith.constant 0 : index
      %188 = vector.load %arg20[%c0_95, %c0_96, %c0_97] : memref<2x2x32xf32, #tpu.memory_space<vmem>>, vector<2x2x32xf32>
      tpu.vector_store %arg20[%c0_95, %c0_96, %c0_97], %187 {strides = array<i32>} : memref<2x2x32xf32, #tpu.memory_space<vmem>>, vector<2x2x32xf32>,
      %cst_98 = arith.constant 0.000000e+00 : f32
      %189 = vector.broadcast %cst_98 : f32 to vector<2x2x32xf32>
      %c0_99 = arith.constant 0 : index
      %c0_100 = arith.constant 0 : index
      %c0_101 = arith.constant 0 : index
      %190 = vector.load %arg21[%c0_99, %c0_100, %c0_101] : memref<2x2x32xf32, #tpu.memory_space<vmem>>, vector<2x2x32xf32>
      tpu.vector_store %arg21[%c0_99, %c0_100, %c0_101], %189 {strides = array<i32>} : memref<2x2x32xf32, #tpu.memory_space<vmem>>, vector<2x2x32xf32>,
      %cst_102 = arith.constant 0.000000e+00 : f32
      %191 = vector.broadcast %cst_102 : f32 to vector<2x32xf32>
      %c0_103 = arith.constant 0 : index
      %c0_104 = arith.constant 0 : index
      %192 = vector.load %arg22[%c0_103, %c0_104] : memref<2x32xf32, #tpu.memory_space<vmem>>, vector<2x32xf32>
      tpu.vector_store %arg22[%c0_103, %c0_104], %191 {strides = array<i32>} : memref<2x32xf32, #tpu.memory_space<vmem>>, vector<2x32xf32>,
      %c0_105 = arith.constant 0 : index
      %c0_106 = arith.constant 0 : index
      %193 = vector.load %arg5[%c0_105, %c0_106] : memref<2x16xf32, #tpu.memory_space<vmem>>, vector<2x16xf32>
      %c0_107 = arith.constant 0 : index
      %c0_108 = arith.constant 0 : index
      %194 = vector.load %arg23[%c0_107, %c0_108] : memref<2x16xf32, #tpu.memory_space<vmem>>, vector<2x16xf32>
      tpu.vector_store %arg23[%c0_107, %c0_108], %193 {strides = array<i32>} : memref<2x16xf32, #tpu.memory_space<vmem>>, vector<2x16xf32>,
    } else {
    }
    %cst = arith.constant 0.000000e+00 : f32
    %3 = vector.broadcast %cst : f32 to vector<2x2xf32>
    %c0 = arith.constant 0 : index
    %c0_1 = arith.constant 0 : index
    %4 = vector.load %arg23[%c0, %c0_1] : memref<2x16xf32, #tpu.memory_space<vmem>>, vector<2x16xf32>
    %5 = tpu.concatenate %3, %4, %3 in 1 : vector<2x2xf32>, vector<2x16xf32>, vector<2x2xf32> -> vector<2x20xf32>
    %cst_2 = arith.constant 0.000000e+00 : f32
    %6 = vector.broadcast %cst_2 : f32 to vector<2x16x32xf32>
    %7 = vector.extract_strided_slice %5 {offsets = [0, 0], sizes = [2, 16], strides = [1, 1]} : vector<2x20xf32> to vector<2x16xf32>
    %8 = vector.shape_cast %7 : vector<2x16xf32> to vector<2x16x1xf32>
    %c0_3 = arith.constant 0 : index
    %c0_4 = arith.constant 0 : index
    %9 = vector.load %arg7[%c0_3, %c0_4] : memref<5x32xf32, #tpu.memory_space<vmem>>, vector<1x32xf32>
    %10 = vector.shape_cast %9 : vector<1x32xf32> to vector<1x1x32xf32>
    %11 = vector.broadcast %8 : vector<2x16x1xf32> to vector<2x16x32xf32>
    %12 = vector.broadcast %10 : vector<1x1x32xf32> to vector<2x16x32xf32>
    %13 = arith.mulf %11, %12 : vector<2x16x32xf32>
    %14 = arith.addf %6, %13 : vector<2x16x32xf32>
    %15 = vector.extract_strided_slice %5 {offsets = [0, 1], sizes = [2, 16], strides = [1, 1]} : vector<2x20xf32> to vector<2x16xf32>
    %16 = vector.shape_cast %15 : vector<2x16xf32> to vector<2x16x1xf32>
    %c1 = arith.constant 1 : index
    %c0_5 = arith.constant 0 : index
    %17 = vector.load %arg7[%c1, %c0_5] : memref<5x32xf32, #tpu.memory_space<vmem>>, vector<1x32xf32>
    %18 = vector.shape_cast %17 : vector<1x32xf32> to vector<1x1x32xf32>
    %19 = vector.broadcast %16 : vector<2x16x1xf32> to vector<2x16x32xf32>
    %20 = vector.broadcast %18 : vector<1x1x32xf32> to vector<2x16x32xf32>
    %21 = arith.mulf %19, %20 : vector<2x16x32xf32>
    %22 = arith.addf %14, %21 : vector<2x16x32xf32>
    %23 = vector.extract_strided_slice %5 {offsets = [0, 2], sizes = [2, 16], strides = [1, 1]} : vector<2x20xf32> to vector<2x16xf32>
    %24 = vector.shape_cast %23 : vector<2x16xf32> to vector<2x16x1xf32>
    %c2 = arith.constant 2 : index
    %c0_6 = arith.constant 0 : index
    %25 = vector.load %arg7[%c2, %c0_6] : memref<5x32xf32, #tpu.memory_space<vmem>>, vector<1x32xf32>
    %26 = vector.shape_cast %25 : vector<1x32xf32> to vector<1x1x32xf32>
    %27 = vector.broadcast %24 : vector<2x16x1xf32> to vector<2x16x32xf32>
    %28 = vector.broadcast %26 : vector<1x1x32xf32> to vector<2x16x32xf32>
    %29 = arith.mulf %27, %28 : vector<2x16x32xf32>
    %30 = arith.addf %22, %29 : vector<2x16x32xf32>
    %31 = vector.extract_strided_slice %5 {offsets = [0, 3], sizes = [2, 16], strides = [1, 1]} : vector<2x20xf32> to vector<2x16xf32>
    %32 = vector.shape_cast %31 : vector<2x16xf32> to vector<2x16x1xf32>
    %c3 = arith.constant 3 : index
    %c0_7 = arith.constant 0 : index
    %33 = vector.load %arg7[%c3, %c0_7] : memref<5x32xf32, #tpu.memory_space<vmem>>, vector<1x32xf32>
    %34 = vector.shape_cast %33 : vector<1x32xf32> to vector<1x1x32xf32>
    %35 = vector.broadcast %32 : vector<2x16x1xf32> to vector<2x16x32xf32>
    %36 = vector.broadcast %34 : vector<1x1x32xf32> to vector<2x16x32xf32>
    %37 = arith.mulf %35, %36 : vector<2x16x32xf32>
    %38 = arith.addf %30, %37 : vector<2x16x32xf32>
    %39 = vector.extract_strided_slice %5 {offsets = [0, 4], sizes = [2, 16], strides = [1, 1]} : vector<2x20xf32> to vector<2x16xf32>
    %40 = vector.shape_cast %39 : vector<2x16xf32> to vector<2x16x1xf32>
    %c4 = arith.constant 4 : index
    %c0_8 = arith.constant 0 : index
    %41 = vector.load %arg7[%c4, %c0_8] : memref<5x32xf32, #tpu.memory_space<vmem>>, vector<1x32xf32>
    %42 = vector.shape_cast %41 : vector<1x32xf32> to vector<1x1x32xf32>
    %43 = vector.broadcast %40 : vector<2x16x1xf32> to vector<2x16x32xf32>
    %44 = vector.broadcast %42 : vector<1x1x32xf32> to vector<2x16x32xf32>
    %45 = arith.mulf %43, %44 : vector<2x16x32xf32>
    %46 = arith.addf %38, %45 : vector<2x16x32xf32>
    %c0_9 = arith.constant 0 : index
    %c0_10 = arith.constant 0 : index
    %47 = vector.load %arg22[%c0_9, %c0_10] : memref<2x32xf32, #tpu.memory_space<vmem>>, vector<2x32xf32>
    %c0_11 = arith.constant 0 : index
    %c0_12 = arith.constant 0 : index
    %48 = vector.load %arg6[%c0_11, %c0_12] : memref<32x32xf32, #tpu.memory_space<vmem>>, vector<32x32xf32>
    %cst_13 = arith.constant dense<0.000000e+00> : vector<2x32xf32>
    %49 = tpu.matmul %47, %48, %cst_13 {dimension_numbers = #tpu.dot_dimension_numbers<[1], [0], [0], [1], [0, 0, 1, 1], [], []>} : vector<2x32xf32>, vector<32x32xf32>, vector<2x32xf32> -> vector<2x32xf32>
    %c0_14 = arith.constant 0 : index
    %c0_15 = arith.constant 0 : index
    %c0_16 = arith.constant 0 : index
    %50 = vector.load %arg2[%c0_14, %c0_15, %c0_16] : memref<2x16x32xf32, #tpu.memory_space<vmem>>, vector<2x16x32xf32>
    %51 = vector.shape_cast %49 : vector<2x32xf32> to vector<2x1x32xf32>
    %52 = vector.broadcast %51 : vector<2x1x32xf32> to vector<2x16x32xf32>
    %53 = arith.addf %50, %52 : vector<2x16x32xf32>
    %54 = arith.addf %53, %46 : vector<2x16x32xf32>
    %c0_17 = arith.constant 0 : index
    %c0_18 = arith.constant 0 : index
    %55 = vector.load %arg8[%c0_17, %c0_18] : memref<1x32xf32, #tpu.memory_space<vmem>>, vector<1x32xf32>
    %56 = vector.shape_cast %55 : vector<1x32xf32> to vector<1x1x32xf32>
    %57 = vector.broadcast %56 : vector<1x1x32xf32> to vector<2x16x32xf32>
    %58 = arith.addf %54, %57 : vector<2x16x32xf32>
    %59 = math.tanh %58 : vector<2x16x32xf32>
    %c0_19 = arith.constant 0 : index
    %c0_20 = arith.constant 0 : index
    %60 = vector.load %arg9[%c0_19, %c0_20] : memref<1x32xf32, #tpu.memory_space<vmem>>, vector<1x32xf32>
    %61 = vector.shape_cast %60 : vector<1x32xf32> to vector<1x1x32xf32>
    %62 = vector.broadcast %61 : vector<1x1x32xf32> to vector<2x16x32xf32>
    %63 = arith.mulf %59, %62 : vector<2x16x32xf32>
    %cst_21 = arith.constant dense<0.000000e+00> : vector<2x16xf32>
    %64 = vector.multi_reduction <add>, %63, %cst_21 [2] : vector<2x16x32xf32> to vector<2x16xf32>
    %c0_22 = arith.constant 0 : index
    %c0_23 = arith.constant 0 : index
    %65 = vector.load %arg4[%c0_22, %c0_23] : memref<2x16xf32, #tpu.memory_space<vmem>>, vector<2x16xf32>
    %cst_24 = arith.constant 0.000000e+00 : f32
    %66 = vector.broadcast %cst_24 : f32 to vector<2x16xf32>
    %67 = arith.cmpf ogt, %65, %66 : vector<2x16xf32>
    %cst_25 = arith.constant -1.000000e+30 : f32
    %68 = vector.broadcast %cst_25 : f32 to vector<2x16xf32>
    %69 = arith.select %67, %64, %68 : vector<2x16xi1>, vector<2x16xf32>
    %cst_26 = arith.constant 1.000000e+00 : f32
    %70 = vector.broadcast %cst_26 : f32 to vector<2x16xf32>
    %71 = arith.mulf %69, %70 : vector<2x16xf32>
    %cst_27 = arith.constant dense<0xFF800000> : vector<2xf32>
    %72 = vector.multi_reduction <maximumf>, %71, %cst_27 [1] : vector<2x16xf32> to vector<2xf32>
    %73 = vector.shape_cast %72 : vector<2xf32> to vector<2x1xf32>
    %74 = vector.broadcast %73 : vector<2x1xf32> to vector<2x16xf32>
    %75 = arith.subf %71, %74 : vector<2x16xf32>
    %76 = math.exp %75 : vector<2x16xf32>
    %77 = arith.mulf %76, %65 : vector<2x16xf32>
    %cst_28 = arith.constant dense<0.000000e+00> : vector<2xf32>
    %78 = vector.multi_reduction <add>, %77, %cst_28 [1] : vector<2x16xf32> to vector<2xf32>
    %79 = vector.shape_cast %78 : vector<2xf32> to vector<2x1xf32>
    %80 = tpu.reciprocal %79 {approx = true} : vector<2x1xf32> -> vector<2x1xf32>
    %81 = vector.broadcast %80 : vector<2x1xf32> to vector<2x16xf32>
    %82 = arith.mulf %77, %81 : vector<2x16xf32>
    %c0_29 = arith.constant 0 : index
    %c0_30 = arith.constant 0 : index
    %83 = vector.load %arg23[%c0_29, %c0_30] : memref<2x16xf32, #tpu.memory_space<vmem>>, vector<2x16xf32>
    tpu.vector_store %arg23[%c0_29, %c0_30], %82 {strides = array<i32>} : memref<2x16xf32, #tpu.memory_space<vmem>>, vector<2x16xf32>,
    %84 = vector.shape_cast %82 : vector<2x16xf32> to vector<2x16x1xf32>
    %c0_31 = arith.constant 0 : index
    %c0_32 = arith.constant 0 : index
    %c0_33 = arith.constant 0 : index
    %85 = vector.load %arg3[%c0_31, %c0_32, %c0_33] : memref<2x16x32xf32, #tpu.memory_space<vmem>>, vector<2x16x32xf32>
    %86 = vector.broadcast %84 : vector<2x16x1xf32> to vector<2x16x32xf32>
    %87 = arith.mulf %86, %85 : vector<2x16x32xf32>
    %cst_34 = arith.constant dense<0.000000e+00> : vector<2x32xf32>
    %88 = vector.multi_reduction <add>, %87, %cst_34 [1] : vector<2x16x32xf32> to vector<2x32xf32>
    %c0_35 = arith.constant 0 : index
    %c0_36 = arith.constant 0 : index
    %c0_37 = arith.constant 0 : index
    %89 = vector.load %arg1[%c0_35, %c0_36, %c0_37] : memref<1x2x32xf32, #tpu.memory_space<vmem>>, vector<1x2x32xf32>
    %90 = vector.shape_cast %89 : vector<1x2x32xf32> to vector<2x32xf32>
    %91 = tpu.concatenate %90, %88 in 1 : vector<2x32xf32>, vector<2x32xf32> -> vector<2x64xf32>
    %c0_38 = arith.constant 0 : index
    %c0_39 = arith.constant 0 : index
    %92 = vector.load %arg13[%c0_38, %c0_39] : memref<64x128xf32, #tpu.memory_space<vmem>>, vector<64x128xf32>
    %cst_40 = arith.constant dense<0.000000e+00> : vector<2x128xf32>
    %93 = tpu.matmul %91, %92, %cst_40 {dimension_numbers = #tpu.dot_dimension_numbers<[1], [0], [0], [1], [0, 0, 1, 1], [], []>} : vector<2x64xf32>, vector<64x128xf32>, vector<2x128xf32> -> vector<2x128xf32>
    %c0_41 = arith.constant 0 : index
    %c0_42 = arith.constant 0 : index
    %c0_43 = arith.constant 0 : index
    %94 = vector.load %arg20[%c0_41, %c0_42, %c0_43] : memref<2x2x32xf32, #tpu.memory_space<vmem>>, vector<1x2x32xf32>
    %95 = vector.shape_cast %94 : vector<1x2x32xf32> to vector<2x32xf32>
    %c0_44 = arith.constant 0 : index
    %c0_45 = arith.constant 0 : index
    %96 = vector.load %arg14[%c0_44, %c0_45] : memref<32x128xf32, #tpu.memory_space<vmem>>, vector<32x128xf32>
    %cst_46 = arith.constant dense<0.000000e+00> : vector<2x128xf32>
    %97 = tpu.matmul %95, %96, %cst_46 {dimension_numbers = #tpu.dot_dimension_numbers<[1], [0], [0], [1], [0, 0, 1, 1], [], []>} : vector<2x32xf32>, vector<32x128xf32>, vector<2x128xf32> -> vector<2x128xf32>
    %98 = arith.addf %93, %97 : vector<2x128xf32>
    %c0_47 = arith.constant 0 : index
    %c0_48 = arith.constant 0 : index
    %99 = vector.load %arg15[%c0_47, %c0_48] : memref<1x128xf32, #tpu.memory_space<vmem>>, vector<1x128xf32>
    %100 = vector.broadcast %99 : vector<1x128xf32> to vector<2x128xf32>
    %101 = arith.addf %98, %100 : vector<2x128xf32>
    %102 = vector.extract_strided_slice %101 {offsets = [0, 0], sizes = [2, 32], strides = [1, 1]} : vector<2x128xf32> to vector<2x32xf32>
    %103 = arith.negf %102 : vector<2x32xf32>
    %104 = math.exp %103 : vector<2x32xf32>
    %cst_49 = arith.constant 1.000000e+00 : f32
    %105 = vector.broadcast %cst_49 : f32 to vector<2x32xf32>
    %106 = arith.addf %105, %104 : vector<2x32xf32>
    %107 = arith.divf %105, %106 : vector<2x32xf32>
    %108 = vector.extract_strided_slice %101 {offsets = [0, 32], sizes = [2, 32], strides = [1, 1]} : vector<2x128xf32> to vector<2x32xf32>
    %109 = arith.negf %108 : vector<2x32xf32>
    %110 = math.exp %109 : vector<2x32xf32>
    %cst_50 = arith.constant 1.000000e+00 : f32
    %111 = vector.broadcast %cst_50 : f32 to vector<2x32xf32>
    %112 = arith.addf %111, %110 : vector<2x32xf32>
    %113 = arith.divf %111, %112 : vector<2x32xf32>
    %114 = vector.extract_strided_slice %101 {offsets = [0, 64], sizes = [2, 32], strides = [1, 1]} : vector<2x128xf32> to vector<2x32xf32>
    %115 = math.tanh %114 : vector<2x32xf32>
    %116 = vector.extract_strided_slice %101 {offsets = [0, 96], sizes = [2, 32], strides = [1, 1]} : vector<2x128xf32> to vector<2x32xf32>
    %117 = arith.negf %116 : vector<2x32xf32>
    %118 = math.exp %117 : vector<2x32xf32>
    %cst_51 = arith.constant 1.000000e+00 : f32
    %119 = vector.broadcast %cst_51 : f32 to vector<2x32xf32>
    %120 = arith.addf %119, %118 : vector<2x32xf32>
    %121 = arith.divf %119, %120 : vector<2x32xf32>
    %c0_52 = arith.constant 0 : index
    %c0_53 = arith.constant 0 : index
    %c0_54 = arith.constant 0 : index
    %122 = vector.load %arg21[%c0_52, %c0_53, %c0_54] : memref<2x2x32xf32, #tpu.memory_space<vmem>>, vector<1x2x32xf32>
    %123 = vector.shape_cast %122 : vector<1x2x32xf32> to vector<2x32xf32>
    %124 = arith.mulf %113, %123 : vector<2x32xf32>
    %125 = arith.mulf %107, %115 : vector<2x32xf32>
    %126 = arith.addf %124, %125 : vector<2x32xf32>
    %127 = math.tanh %126 : vector<2x32xf32>
    %128 = arith.mulf %121, %127 : vector<2x32xf32>
    %c0_55 = arith.constant 0 : index
    %c0_56 = arith.constant 0 : index
    %c0_57 = arith.constant 0 : index
    %129 = vector.load %arg20[%c0_55, %c0_56, %c0_57] : memref<2x2x32xf32, #tpu.memory_space<vmem>>, vector<1x2x32xf32>
    %130 = vector.shape_cast %129 : vector<1x2x32xf32> to vector<2x32xf32>
    %131 = vector.shape_cast %128 : vector<2x32xf32> to vector<1x2x32xf32>
    tpu.vector_store %arg20[%c0_55, %c0_56, %c0_57], %131 {strides = array<i32>} : memref<2x2x32xf32, #tpu.memory_space<vmem>>, vector<1x2x32xf32>,
    %c0_58 = arith.constant 0 : index
    %c0_59 = arith.constant 0 : index
    %c0_60 = arith.constant 0 : index
    %132 = vector.load %arg21[%c0_58, %c0_59, %c0_60] : memref<2x2x32xf32, #tpu.memory_space<vmem>>, vector<1x2x32xf32>
    %133 = vector.shape_cast %132 : vector<1x2x32xf32> to vector<2x32xf32>
    %134 = vector.shape_cast %126 : vector<2x32xf32> to vector<1x2x32xf32>
    tpu.vector_store %arg21[%c0_58, %c0_59, %c0_60], %134 {strides = array<i32>} : memref<2x2x32xf32, #tpu.memory_space<vmem>>, vector<1x2x32xf32>,
    %c0_61 = arith.constant 0 : index
    %c0_62 = arith.constant 0 : index
    %135 = vector.load %arg16[%c0_61, %c0_62] : memref<32x128xf32, #tpu.memory_space<vmem>>, vector<32x128xf32>
    %cst_63 = arith.constant dense<0.000000e+00> : vector<2x128xf32>
    %136 = tpu.matmul %128, %135, %cst_63 {dimension_numbers = #tpu.dot_dimension_numbers<[1], [0], [0], [1], [0, 0, 1, 1], [], []>} : vector<2x32xf32>, vector<32x128xf32>, vector<2x128xf32> -> vector<2x128xf32>
    %c1_64 = arith.constant 1 : index
    %c0_65 = arith.constant 0 : index
    %c0_66 = arith.constant 0 : index
    %137 = vector.load %arg20[%c1_64, %c0_65, %c0_66] : memref<2x2x32xf32, #tpu.memory_space<vmem>>, vector<1x2x32xf32>
    %138 = vector.shape_cast %137 : vector<1x2x32xf32> to vector<2x32xf32>
    %c0_67 = arith.constant 0 : index
    %c0_68 = arith.constant 0 : index
    %139 = vector.load %arg17[%c0_67, %c0_68] : memref<32x128xf32, #tpu.memory_space<vmem>>, vector<32x128xf32>
    %cst_69 = arith.constant dense<0.000000e+00> : vector<2x128xf32>
    %140 = tpu.matmul %138, %139, %cst_69 {dimension_numbers = #tpu.dot_dimension_numbers<[1], [0], [0], [1], [0, 0, 1, 1], [], []>} : vector<2x32xf32>, vector<32x128xf32>, vector<2x128xf32> -> vector<2x128xf32>
    %141 = arith.addf %136, %140 : vector<2x128xf32>
    %c0_70 = arith.constant 0 : index
    %c0_71 = arith.constant 0 : index
    %142 = vector.load %arg18[%c0_70, %c0_71] : memref<1x128xf32, #tpu.memory_space<vmem>>, vector<1x128xf32>
    %143 = vector.broadcast %142 : vector<1x128xf32> to vector<2x128xf32>
    %144 = arith.addf %141, %143 : vector<2x128xf32>
    %145 = vector.extract_strided_slice %144 {offsets = [0, 0], sizes = [2, 32], strides = [1, 1]} : vector<2x128xf32> to vector<2x32xf32>
    %146 = arith.negf %145 : vector<2x32xf32>
    %147 = math.exp %146 : vector<2x32xf32>
    %cst_72 = arith.constant 1.000000e+00 : f32
    %148 = vector.broadcast %cst_72 : f32 to vector<2x32xf32>
    %149 = arith.addf %148, %147 : vector<2x32xf32>
    %150 = arith.divf %148, %149 : vector<2x32xf32>
    %151 = vector.extract_strided_slice %144 {offsets = [0, 32], sizes = [2, 32], strides = [1, 1]} : vector<2x128xf32> to vector<2x32xf32>
    %152 = arith.negf %151 : vector<2x32xf32>
    %153 = math.exp %152 : vector<2x32xf32>
    %cst_73 = arith.constant 1.000000e+00 : f32
    %154 = vector.broadcast %cst_73 : f32 to vector<2x32xf32>
    %155 = arith.addf %154, %153 : vector<2x32xf32>
    %156 = arith.divf %154, %155 : vector<2x32xf32>
    %157 = vector.extract_strided_slice %144 {offsets = [0, 64], sizes = [2, 32], strides = [1, 1]} : vector<2x128xf32> to vector<2x32xf32>
    %158 = math.tanh %157 : vector<2x32xf32>
    %159 = vector.extract_strided_slice %144 {offsets = [0, 96], sizes = [2, 32], strides = [1, 1]} : vector<2x128xf32> to vector<2x32xf32>
    %160 = arith.negf %159 : vector<2x32xf32>
    %161 = math.exp %160 : vector<2x32xf32>
    %cst_74 = arith.constant 1.000000e+00 : f32
    %162 = vector.broadcast %cst_74 : f32 to vector<2x32xf32>
    %163 = arith.addf %162, %161 : vector<2x32xf32>
    %164 = arith.divf %162, %163 : vector<2x32xf32>
    %c1_75 = arith.constant 1 : index
    %c0_76 = arith.constant 0 : index
    %c0_77 = arith.constant 0 : index
    %165 = vector.load %arg21[%c1_75, %c0_76, %c0_77] : memref<2x2x32xf32, #tpu.memory_space<vmem>>, vector<1x2x32xf32>
    %166 = vector.shape_cast %165 : vector<1x2x32xf32> to vector<2x32xf32>
    %167 = arith.mulf %156, %166 : vector<2x32xf32>
    %168 = arith.mulf %150, %158 : vector<2x32xf32>
    %169 = arith.addf %167, %168 : vector<2x32xf32>
    %170 = math.tanh %169 : vector<2x32xf32>
    %171 = arith.mulf %164, %170 : vector<2x32xf32>
    %c1_78 = arith.constant 1 : index
    %c0_79 = arith.constant 0 : index
    %c0_80 = arith.constant 0 : index
    %172 = vector.load %arg20[%c1_78, %c0_79, %c0_80] : memref<2x2x32xf32, #tpu.memory_space<vmem>>, vector<1x2x32xf32>
    %173 = vector.shape_cast %172 : vector<1x2x32xf32> to vector<2x32xf32>
    %174 = vector.shape_cast %171 : vector<2x32xf32> to vector<1x2x32xf32>
    tpu.vector_store %arg20[%c1_78, %c0_79, %c0_80], %174 {strides = array<i32>} : memref<2x2x32xf32, #tpu.memory_space<vmem>>, vector<1x2x32xf32>,
    %c1_81 = arith.constant 1 : index
    %c0_82 = arith.constant 0 : index
    %c0_83 = arith.constant 0 : index
    %175 = vector.load %arg21[%c1_81, %c0_82, %c0_83] : memref<2x2x32xf32, #tpu.memory_space<vmem>>, vector<1x2x32xf32>
    %176 = vector.shape_cast %175 : vector<1x2x32xf32> to vector<2x32xf32>
    %177 = vector.shape_cast %169 : vector<2x32xf32> to vector<1x2x32xf32>
    tpu.vector_store %arg21[%c1_81, %c0_82, %c0_83], %177 {strides = array<i32>} : memref<2x2x32xf32, #tpu.memory_space<vmem>>, vector<1x2x32xf32>,
    %c0_84 = arith.constant 0 : index
    %c0_85 = arith.constant 0 : index
    %178 = vector.load %arg22[%c0_84, %c0_85] : memref<2x32xf32, #tpu.memory_space<vmem>>, vector<2x32xf32>
    tpu.vector_store %arg22[%c0_84, %c0_85], %171 {strides = array<i32>} : memref<2x32xf32, #tpu.memory_space<vmem>>, vector<2x32xf32>,
    %c0_86 = arith.constant 0 : index
    %c0_87 = arith.constant 0 : index
    %179 = vector.load %arg10[%c0_86, %c0_87] : memref<32x10xf32, #tpu.memory_space<vmem>>, vector<32x10xf32>
    %cst_88 = arith.constant dense<0.000000e+00> : vector<2x10xf32>
    %180 = tpu.matmul %171, %179, %cst_88 {dimension_numbers = #tpu.dot_dimension_numbers<[1], [0], [0], [1], [0, 0, 1, 1], [], []>} : vector<2x32xf32>, vector<32x10xf32>, vector<2x10xf32> -> vector<2x10xf32>
    %c0_89 = arith.constant 0 : index
    %c0_90 = arith.constant 0 : index
    %181 = vector.load %arg11[%c0_89, %c0_90] : memref<1x10xf32, #tpu.memory_space<vmem>>, vector<1x10xf32>
    %182 = vector.broadcast %181 : vector<1x10xf32> to vector<2x10xf32>
    %183 = arith.addf %180, %182 : vector<2x10xf32>
    %c0_91 = arith.constant 0 : index
    %c0_92 = arith.constant 0 : index
    %c0_93 = arith.constant 0 : index
    %184 = vector.load %arg19[%c0_91, %c0_92, %c0_93] : memref<1x2x10xf32, #tpu.memory_space<vmem>>, vector<1x2x10xf32>
    %185 = vector.shape_cast %184 : vector<1x2x10xf32> to vector<2x10xf32>
    %186 = vector.shape_cast %183 : vector<2x10xf32> to vector<1x2x10xf32>
    tpu.vector_store %arg19[%c0_91, %c0_92, %c0_93], %186 {strides = array<i32>} : memref<1x2x10xf32, #tpu.memory_space<vmem>>, vector<1x2x10xf32>,
    return
  }
  func.func @transform_0(%arg0: i32) -> (i32, i32, i32) {
    %c0_i32 = arith.constant 0 : i32
    %c0_i32_0 = arith.constant 0 : i32
    %c0_i32_1 = arith.constant 0 : i32
    return %arg0, %c0_i32, %c0_i32_0 : i32, i32, i32
  }
  func.func @transform_1(%arg0: i32) -> (i32, i32, i32) {
    %c0_i32 = arith.constant 0 : i32
    %c0_i32_0 = arith.constant 0 : i32
    %c0_i32_1 = arith.constant 0 : i32
    %c0_i32_2 = arith.constant 0 : i32
    return %c0_i32, %c0_i32_0, %c0_i32_1 : i32, i32, i32
  }
  func.func @transform_2(%arg0: i32) -> (i32, i32, i32) {
    %c0_i32 = arith.constant 0 : i32
    %c0_i32_0 = arith.constant 0 : i32
    %c0_i32_1 = arith.constant 0 : i32
    %c0_i32_2 = arith.constant 0 : i32
    return %c0_i32, %c0_i32_0, %c0_i32_1 : i32, i32, i32
  }
  func.func @transform_3(%arg0: i32) -> (i32, i32) {
    %c0_i32 = arith.constant 0 : i32
    %c0_i32_0 = arith.constant 0 : i32
    %c0_i32_1 = arith.constant 0 : i32
    return %c0_i32, %c0_i32_0 : i32, i32
  }
  func.func @transform_4(%arg0: i32) -> (i32, i32) {
    %c0_i32 = arith.constant 0 : i32
    %c0_i32_0 = arith.constant 0 : i32
    %c0_i32_1 = arith.constant 0 : i32
    return %c0_i32, %c0_i32_0 : i32, i32
  }
  func.func @transform_5(%arg0: i32) -> (i32, i32) {
    %c0_i32 = arith.constant 0 : i32
    %c0_i32_0 = arith.constant 0 : i32
    %c0_i32_1 = arith.constant 0 : i32
    return %c0_i32, %c0_i32_0 : i32, i32
  }
  func.func @transform_6(%arg0: i32) -> (i32, i32) {
    %c0_i32 = arith.constant 0 : i32
    %c0_i32_0 = arith.constant 0 : i32
    %c0_i32_1 = arith.constant 0 : i32
    return %c0_i32, %c0_i32_0 : i32, i32
  }
  func.func @transform_7(%arg0: i32) -> (i32, i32) {
    %c0_i32 = arith.constant 0 : i32
    %c0_i32_0 = arith.constant 0 : i32
    %c0_i32_1 = arith.constant 0 : i32
    return %c0_i32, %c0_i32_0 : i32, i32
  }
  func.func @transform_8(%arg0: i32) -> (i32, i32) {
    %c0_i32 = arith.constant 0 : i32
    %c0_i32_0 = arith.constant 0 : i32
    %c0_i32_1 = arith.constant 0 : i32
    return %c0_i32, %c0_i32_0 : i32, i32
  }
  func.func @transform_9(%arg0: i32) -> (i32, i32) {
    %c0_i32 = arith.constant 0 : i32
    %c0_i32_0 = arith.constant 0 : i32
    %c0_i32_1 = arith.constant 0 : i32
    return %c0_i32, %c0_i32_0 : i32, i32
  }
  func.func @transform_10(%arg0: i32) -> (i32, i32) {
    %c0_i32 = arith.constant 0 : i32
    %c0_i32_0 = arith.constant 0 : i32
    %c0_i32_1 = arith.constant 0 : i32
    return %c0_i32, %c0_i32_0 : i32, i32
  }
  func.func @transform_11(%arg0: i32) -> (i32, i32) {
    %c0_i32 = arith.constant 0 : i32
    %c0_i32_0 = arith.constant 0 : i32
    %c0_i32_1 = arith.constant 0 : i32
    return %c0_i32, %c0_i32_0 : i32, i32
  }
  func.func @transform_12(%arg0: i32) -> (i32, i32) {
    %c0_i32 = arith.constant 0 : i32
    %c0_i32_0 = arith.constant 0 : i32
    %c0_i32_1 = arith.constant 0 : i32
    return %c0_i32, %c0_i32_0 : i32, i32
  }
  func.func @transform_13(%arg0: i32) -> (i32, i32) {
    %c0_i32 = arith.constant 0 : i32
    %c0_i32_0 = arith.constant 0 : i32
    %c0_i32_1 = arith.constant 0 : i32
    return %c0_i32, %c0_i32_0 : i32, i32
  }
  func.func @transform_14(%arg0: i32) -> (i32, i32) {
    %c0_i32 = arith.constant 0 : i32
    %c0_i32_0 = arith.constant 0 : i32
    %c0_i32_1 = arith.constant 0 : i32
    return %c0_i32, %c0_i32_0 : i32, i32
  }
  func.func @transform_15(%arg0: i32) -> (i32, i32) {
    %c0_i32 = arith.constant 0 : i32
    %c0_i32_0 = arith.constant 0 : i32
    %c0_i32_1 = arith.constant 0 : i32
    return %c0_i32, %c0_i32_0 : i32, i32
  }
  func.func @transform_16(%arg0: i32) -> (i32, i32) {
    %c0_i32 = arith.constant 0 : i32
    %c0_i32_0 = arith.constant 0 : i32
    %c0_i32_1 = arith.constant 0 : i32
    return %c0_i32, %c0_i32_0 : i32, i32
  }
  func.func @transform_17(%arg0: i32) -> (i32, i32) {
    %c0_i32 = arith.constant 0 : i32
    %c0_i32_0 = arith.constant 0 : i32
    %c0_i32_1 = arith.constant 0 : i32
    return %c0_i32, %c0_i32_0 : i32, i32
  }
  func.func @transform_18(%arg0: i32) -> (i32, i32, i32) {
    %c0_i32 = arith.constant 0 : i32
    %c0_i32_0 = arith.constant 0 : i32
    %c0_i32_1 = arith.constant 0 : i32
    return %arg0, %c0_i32, %c0_i32_0 : i32, i32, i32
  }
}

</mosaic_0001>

<bundles_post_ra>
// kernel: e2e_forward.15
= control target key start
LH: loop header
LB: loop body
LE: loop exit
PB: predicated region body
PF: predicated region fallthrough
CT: control target
= control target key end

     0   :  { %s343_s9 = smov 0   ;;  %s380_s0 = inlined_call_operand.vmem [shape: f32[16,2,128], index: 0, kind: input, shape index: {}]   ;;  %s381_s1 = inlined_call_operand.vmem [shape: f32[32,128], index: 1, kind: input, shape index: {}]   ;;  %s382_s2 = inlined_call_operand.vmem [shape: f32[16,2,32], index: 2, kind: output, shape index: {}]  }
   0x1 LB: > { %s284_s10 = sadd.s32 4294967295, %s322_s9   ;;  %p288_p0 = scmp.ge.s32.totalorder %s322_s9, 1  ;;  %s322_s9 = sphi %s343_s9, %s12_s9  }
   0x2   : > { %p111_p1 = scmp.lt.s32.totalorder %s322_s9, 17 }
   0x4   : > { %p112_p2 = pnand %p288_p0, %p111_p1 }
   0x5   : > { %p131_p3 = scmp.lt.s32.totalorder (!%p112_p2), %s284_s10, 15  ;;  %p291_p4 = scmp.ne.s32.totalorder (!%p112_p2), %s284_s10, 0 }
   0x6   : > { %115 = sbr.rel (%p112_p2) target bundleno = 621 (0x26d), region = 28 }
   0xb   : > { %s132_s11 = scalar_select %p131_p3, %s284_s10, 15 }
   0xc   : > { %142 = sbr.rel (%p291_p4) target bundleno = 20 (0x14), region = 32 }
   0xd   : > { %s289_s12 = sshll.u32 %s132_s11, 1 }
   0xe   : > { %s134_s15 = scalar_lea.vmem %s380_s0, %s289_s12  ;;  %s357_s18 = scalar_lea.vmem %s382_s2, %s289_s12 }
  0x11   : > { %vm143_vm0 = vcmask 254976   ;;  %v324_v0 = vmov 0.0  }
  0x12   : > { %144 = vst.msk [vmem:[#allocation2] sm:$0x3] %vm143_vm0, %v324_v0 }
  0x13   : > { %145 = vst.msk [vmem:[#allocation3] sm:$0x3] %vm143_vm0, %v324_v0 }
  0x14 PF: > { %v151_v1 = vld [vmem:[%s381_s1 + $0x18] sm:$0xff]  ;;  %v150_v2 = vld [vmem:[%s381_s1 + $0x10] sm:$0xff]  ;;  %v149_v3 = vld [vmem:[%s381_s1 + $0x8] sm:$0xff]  ;;  %vm152_vm1 = vcmask 261120   ;;  %s325_s27 = smov 64   ;;  %s326_s28 = smov 32  }
  0x15   : > { %168 = vmatpush.msra.mxu0 %v151_v1  ;;  %v148_v4 = vld [vmem:[%s381_s1] sm:$0xff]  ;;  %s327_s29 = smov 96   ;;  %vm223_vm6 = vcmask 254976  }
  0x16   : > { %v146_v6 = vld [vmem:[%s134_s15] sm:$0x3] }
  0x17   : > { %169 = vmatpush.msra.mxu0 %v150_v2 }
  0x19   : > { %170 = vmatpush.msra.mxu0 %v149_v3  ;;  %v147_v5 = vld [vmem:[#allocation2] sm:$0x3] }
  0x1a   : > { %v197_v10 = vld [vmem:[#allocation3] sm:$0x3] }
  0x1b   : > { %171 = vmatpush.msra.mxu0 %v148_v4 }
  0x1c   : > { %292 = vmatmul.msk.f32.vlgmr.msra.gmra.mxu0 %vm152_vm1, %v147_v5 }
  0x99   : > { %v173_v7 = vpop.f32.mrf.mxu0 }
  0x9a   : > { %v176_v8 = vadd.f32 %v173_v7, %v146_v6 }
  0x9c   : > { %308 = vtanh.f32 %v176_v8  ;;  %v293_v11 = vmul.f32 -1.442695, %v176_v8 }
  0x9e   : > { %310 = vpow2.f32 %v293_v11 }
  0xa2   : > { %v309_v9 = vpop.eup %308 }
  0xa3   : > { %204 = vrot.lane.b32.xlu0 %v309_v9, %s325_s27 }
  0xa4   : > { %v311_v12 = vpop.eup %310 }
  0xa5   : > { %v180_v13 = vadd.f32 1.0, %v311_v12 }
  0xa7   : > { %312 = vrcp.f32 %v180_v13  ;;  %v192_v19 = vand.u32 2147483648, %v180_v13  ;;  %vm186_vm3 = vweird.f32 %v180_v13  ;;  %v190_v20 = vand.u32 2147483647, %v180_v13 }
  0xa9   : > { %v193_v22 = vor.u32 1.1754944e-38, %v192_v19  ;;  %vm191_vm5 = vcmp.eq.f32.partialorder %v190_v20, 8.507059e+37 }
  0xab   : > { %199 = vrot.lane.b32.xlu0 %v197_v10, %s326_s28 }
  0xad   : > { %v313_v14 = vpop.eup %312 }
  0xae   : > { %v182_v15 = vmul.f32 %v313_v14, %v180_v13  ;;  %vm187_vm2 = vweird.f32 %v313_v14 }
  0xaf   : > { %vm188_vm4 = vmor %vm186_vm3, %vm187_vm2 }
  0xb0   : > { %v183_v16 = vsub.f32 1.0, %v182_v15 }
  0xb2   : > { %v184_v17 = vmul.f32 %v313_v14, %v183_v16 }
  0xb4   : > { %v185_v18 = vadd.f32 %v313_v14, %v184_v17 }
  0xb6   : > { %v189_v21 = vsel %vm188_vm4, %v313_v14, %v185_v18 }
  0xb7   : > { %v194_v24 = vsel %vm191_vm5, %v193_v22, %v189_v21 }
 0x115   : > { %v205_v23 = vpop.permute.xlu0 %204 }
 0x116   : > { %v207_v25 = vmul.f32 %v205_v23, %v194_v24 }
 0x118   : > { %209 = vrot.lane.b32.xlu1 %v207_v25, %s326_s28 }
 0x11d   : > { %v200_v26 = vpop.permute.xlu0 %199 }
 0x11e   : > { %v202_v27 = vmul.f32 %v200_v26, %v194_v24 }
 0x18a   : > { %v210_v28 = vpop.permute.xlu1 %209 }
 0x18b   : > { %v212_v29 = vadd.f32 %v210_v28, %v202_v27 }
 0x18d   : > { %314 = vtanh.f32 %v212_v29 }
 0x193   : > { %v315_v30 = vpop.eup %314 }
 0x194   : > { %215 = vrot.lane.b32.xlu1 %v315_v30, %s325_s27 }
 0x206   : > { %v216_v31 = vpop.permute.xlu1 %215 }
 0x207   : > { %v218_v32 = vmul.f32 %v216_v31, %v194_v24 }
 0x209   : > { %220 = vrot.lane.b32.xlu2 %v218_v32, %s326_s28 }
 0x211   : > { %226 = vrot.lane.b32.xlu2 %v212_v29, %s327_s29 }
 0x263   : > { %v221_v33 = vpop.permute.xlu2 %220 }
 0x264   : > { %224 = vst.msk [vmem:[#allocation2] sm:$0x3] %vm223_vm6, %v221_v33 }
 0x265   : > { %230 = vst.msk [vmem:[%s357_s18] sm:$0x3] %vm223_vm6, %v221_v33 }
 0x26b   : > { %v227_v34 = vpop.permute.xlu2 %226 }
 0x26c   : > { %229 = vst.msk [vmem:[#allocation3] sm:$0x3] %vm223_vm6, %v227_v34 }
 0x26d PF: > { %s12_s9 = sadd.s32 1, %s322_s9  }
 0x26e   : > { %p9_p5 = scmp.ge.s32.totalorder %s12_s9, 18  }
 0x270   :  { %11 = sbr.rel (!%p9_p5) target bundleno = 1 (0x1), region = 62 }

// kernel: e2e_forward.14
= control target key start
LH: loop header
LB: loop body
LE: loop exit
PB: predicated region body
PF: predicated region fallthrough
CT: control target
= control target key end

     0   :  { %vm24_vm0 = vcmask 130048   ;;  %s138_s1 = inlined_call_operand.vmem [shape: f32[16,128], index: 1, kind: input, shape index: {}]   ;;  %s139_s0 = inlined_call_operand.vmem [shape: f32[32,16], index: 0, kind: input, shape index: {}]   ;;  %s140_s2 = inlined_call_operand.vmem [shape: f32[1,128], index: 2, kind: input, shape index: {}]   ;;  %s141_s3 = inlined_call_operand.vmem [shape: f32[32,128], index: 3, kind: output, shape index: {}]  }
   0x1   :  { %v19_v0 = vld [vmem:[%s138_s1 + $0x8] sm:$0xff]  ;;  %v18_v1 = vld [vmem:[%s138_s1] sm:$0xff]  ;;  %v16_v2 = vld [vmem:[%s139_s0 + $0x10] sm:$0xff] }
   0x2   :  { %79 = vmatpush.msra.mxu2 %v19_v0  ;;  %80 = vmatpush.msra.mxu3 %v19_v0  ;;  %v17_v3 = vld [vmem:[%s139_s0 + $0x18] sm:$0xff]  ;;  %v14_v4 = vld [vmem:[%s139_s0] sm:$0xff]  ;;  %v15_v5 = vld [vmem:[%s139_s0 + $0x8] sm:$0xff] }
   0x3   :  { %51 = vmatpush.msra.mxu0 %v19_v0  ;;  %78 = vmatpush.msra.mxu1 %v19_v0  ;;  %v84_v6 = vld [vmem:[%s140_s2] ss:$0 sm:$0xff] }
   0x4   :  { %82 = vmatpush.msra.mxu2 %v18_v1  ;;  %83 = vmatpush.msra.mxu3 %v18_v1 }
   0x5   :  { %76 = vmatmul.msk.f32.vlgmr.msra.gmra.mxu2 %vm24_vm0, %v16_v2  ;;  %77 = vmatmul.msk.f32.vlgmr.msra.gmra.mxu3 %vm24_vm0, %v17_v3 }
   0x6   :  { %52 = vmatpush.msra.mxu0 %v18_v1  ;;  %81 = vmatpush.msra.mxu1 %v18_v1 }
   0x7   :  { %74 = vmatmul.msk.f32.vlgmr.msra.gmra.mxu0 %vm24_vm0, %v14_v4  ;;  %75 = vmatmul.msk.f32.vlgmr.msra.gmra.mxu1 %vm24_vm0, %v15_v5 }
  0x84   :  { %v54_v7 = vpop.f32.mrf.mxu0  ;;  %v57_v8 = vpop.f32.mrf.mxu1 }
  0x85   :  { %v55_v9 = vadd.f32 %v84_v6, %v54_v7  ;;  %v58_v10 = vadd.f32 %v84_v6, %v57_v8 }
  0x87   :  { %66 = vst [vmem:[%s141_s3] sm:$0xff] %v55_v9 }
  0x88   :  { %67 = vst [vmem:[%s141_s3 + $0x8] sm:$0xff] %v58_v10  ;;  %v60_v11 = vpop.f32.mrf.mxu2  ;;  %v63_v12 = vpop.f32.mrf.mxu3 }
  0x89   :  { %v61_v13 = vadd.f32 %v84_v6, %v60_v11  ;;  %v64_v14 = vadd.f32 %v84_v6, %v63_v12 }
  0x8b   :  { %68 = vst [vmem:[%s141_s3 + $0x10] sm:$0xff] %v61_v13 }
  0x8c   :  { %69 = vst [vmem:[%s141_s3 + $0x18] sm:$0xff] %v64_v14 }

// kernel: e2e_forward.16
= control target key start
LH: loop header
LB: loop body
LE: loop exit
PB: predicated region body
PF: predicated region fallthrough
CT: control target
= control target key end

     0   :  { %vm30_vm0 = vcmask 523264   ;;  %vm76_vm1 = vcmask 261120   ;;  %s193_s1 = inlined_call_operand.vmem [shape: f32[64,32], index: 1, kind: input, shape index: {}]   ;;  %s194_s2 = inlined_call_operand.vmem [shape: f32[1,32], index: 2, kind: input, shape index: {}]   ;;  %s195_s0 = inlined_call_operand.vmem [shape: f32[32,64], index: 0, kind: input, shape index: {}]   ;;  %s196_s3 = inlined_call_operand.vmem [shape: f32[32,32], index: 3, kind: output, shape index: {}]  }
   0x1   :  { %v25_v0 = vld [vmem:[%s193_s1 + $0x38] sm:$0xff]  ;;  %v24_v1 = vld [vmem:[%s193_s1 + $0x30] sm:$0xff]  ;;  %v23_v2 = vld [vmem:[%s193_s1 + $0x28] sm:$0xff] }
   0x2   :  { %90 = vmatpush.msra.mxu2 %v25_v0  ;;  %91 = vmatpush.msra.mxu3 %v25_v0  ;;  %v22_v3 = vld [vmem:[%s193_s1 + $0x20] sm:$0xff]  ;;  %v21_v4 = vld [vmem:[%s193_s1 + $0x18] sm:$0xff]  ;;  %v20_v5 = vld [vmem:[%s193_s1 + $0x10] sm:$0xff] }
   0x3   :  { %51 = vmatpush.msra.mxu0 %v25_v0  ;;  %89 = vmatpush.msra.mxu1 %v25_v0  ;;  %v19_v6 = vld [vmem:[%s193_s1 + $0x8] sm:$0xff]  ;;  %v18_v7 = vld [vmem:[%s193_s1] sm:$0xff]  ;;  %v16_v8 = vld [vmem:[%s195_s0 + $0x10] sm:$0xff] }
   0x4   :  { %93 = vmatpush.msra.mxu2 %v24_v1  ;;  %94 = vmatpush.msra.mxu3 %v24_v1  ;;  %v17_v9 = vld [vmem:[%s195_s0 + $0x18] sm:$0xff]  ;;  %v14_v10 = vld [vmem:[%s195_s0] sm:$0xff]  ;;  %v15_v11 = vld [vmem:[%s195_s0 + $0x8] sm:$0xff] }
   0x5   :  { %52 = vmatpush.msra.mxu0 %v24_v1  ;;  %92 = vmatpush.msra.mxu1 %v24_v1  ;;  %v113_v12 = vld [vmem:[%s194_s2] ss:$0 sm:$0xff] }
   0x6   :  { %96 = vmatpush.msra.mxu2 %v23_v2  ;;  %97 = vmatpush.msra.mxu3 %v23_v2 }
   0x7   :  { %53 = vmatpush.msra.mxu0 %v23_v2  ;;  %95 = vmatpush.msra.mxu1 %v23_v2 }
   0x8   :  { %99 = vmatpush.msra.mxu2 %v22_v3  ;;  %100 = vmatpush.msra.mxu3 %v22_v3 }
   0x9   :  { %54 = vmatpush.msra.mxu0 %v22_v3  ;;  %98 = vmatpush.msra.mxu1 %v22_v3 }
   0xa   :  { %102 = vmatpush.msra.mxu2 %v21_v4  ;;  %103 = vmatpush.msra.mxu3 %v21_v4 }
   0xb   :  { %55 = vmatpush.msra.mxu0 %v21_v4  ;;  %101 = vmatpush.msra.mxu1 %v21_v4 }
   0xc   :  { %105 = vmatpush.msra.mxu2 %v20_v5  ;;  %106 = vmatpush.msra.mxu3 %v20_v5 }
   0xd   :  { %56 = vmatpush.msra.mxu0 %v20_v5  ;;  %104 = vmatpush.msra.mxu1 %v20_v5 }
   0xe   :  { %108 = vmatpush.msra.mxu2 %v19_v6  ;;  %109 = vmatpush.msra.mxu3 %v19_v6 }
   0xf   :  { %57 = vmatpush.msra.mxu0 %v19_v6  ;;  %107 = vmatpush.msra.mxu1 %v19_v6 }
  0x10   :  { %111 = vmatpush.msra.mxu2 %v18_v7  ;;  %112 = vmatpush.msra.mxu3 %v18_v7 }
  0x11   :  { %87 = vmatmul.msk.f32.vlgmr.msra.gmra.mxu2 %vm30_vm0, %v16_v8  ;;  %88 = vmatmul.msk.f32.vlgmr.msra.gmra.mxu3 %vm30_vm0, %v17_v9 }
  0x12   :  { %58 = vmatpush.msra.mxu0 %v18_v7  ;;  %110 = vmatpush.msra.mxu1 %v18_v7 }
  0x13   :  { %85 = vmatmul.msk.f32.vlgmr.msra.gmra.mxu0 %vm30_vm0, %v14_v10  ;;  %86 = vmatmul.msk.f32.vlgmr.msra.gmra.mxu1 %vm30_vm0, %v15_v11 }
  0x90   :  { %v60_v13 = vpop.f32.mrf.mxu0  ;;  %v63_v14 = vpop.f32.mrf.mxu1 }
  0x91   :  { %v61_v15 = vadd.f32 %v113_v12, %v60_v13  ;;  %v64_v16 = vadd.f32 %v113_v12, %v63_v14 }
  0x93   :  { %114 = vtanh.f32 %v61_v15 }
  0x94   :  { %116 = vtanh.f32 %v64_v16  ;;  %v66_v17 = vpop.f32.mrf.mxu2  ;;  %v69_v18 = vpop.f32.mrf.mxu3 }
  0x95   :  { %v67_v19 = vadd.f32 %v113_v12, %v66_v17  ;;  %v70_v20 = vadd.f32 %v113_v12, %v69_v18 }
  0x97   :  { %118 = vtanh.f32 %v67_v19 }
  0x98   :  { %120 = vtanh.f32 %v70_v20 }
  0x99   :  { %v115_v21 = vpop.eup %114 }
  0x9a   :  { %v117_v22 = vpop.eup %116  ;;  %77 = vst.msk [vmem:[%s196_s3] sm:$0xff] %vm76_vm1, %v115_v21 }
  0x9b   :  { %78 = vst.msk [vmem:[%s196_s3 + $0x8] sm:$0xff] %vm76_vm1, %v117_v22 }
  0x9d   :  { %v119_v23 = vpop.eup %118 }
  0x9e   :  { %v121_v24 = vpop.eup %120  ;;  %79 = vst.msk [vmem:[%s196_s3 + $0x10] sm:$0xff] %vm76_vm1, %v119_v23 }
  0x9f   :  { %80 = vst.msk [vmem:[%s196_s3 + $0x18] sm:$0xff] %vm76_vm1, %v121_v24 }

// kernel: e2e_forward.19
= control target key start
LH: loop header
LB: loop body
LE: loop exit
PB: predicated region body
PF: predicated region fallthrough
CT: control target
= control target key end

     0   :  { %vm26_vm0 = vcmask 261120   ;;  %s152_s1 = inlined_call_operand.vmem [shape: f32[32,128], index: 1, kind: input, shape index: {}]   ;;  %s153_s2 = inlined_call_operand.vmem [shape: f32[1,128], index: 2, kind: input, shape index: {}]   ;;  %s154_s0 = inlined_call_operand.vmem [shape: f32[32,32], index: 0, kind: input, shape index: {}]   ;;  %s155_s3 = inlined_call_operand.vmem [shape: f32[32,128], index: 3, kind: output, shape index: {}]  }
   0x1   :  { %v21_v0 = vld [vmem:[%s152_s1 + $0x18] sm:$0xff]  ;;  %v20_v1 = vld [vmem:[%s152_s1 + $0x10] sm:$0xff]  ;;  %v19_v2 = vld [vmem:[%s152_s1 + $0x8] sm:$0xff] }
   0x2   :  { %81 = vmatpush.msra.mxu2 %v21_v0  ;;  %82 = vmatpush.msra.mxu3 %v21_v0  ;;  %v18_v3 = vld [vmem:[%s152_s1] sm:$0xff]  ;;  %v16_v4 = vld [vmem:[%s154_s0 + $0x10] sm:$0xff]  ;;  %v17_v5 = vld [vmem:[%s154_s0 + $0x18] sm:$0xff] }
   0x3   :  { %51 = vmatpush.msra.mxu0 %v21_v0  ;;  %80 = vmatpush.msra.mxu1 %v21_v0  ;;  %v14_v6 = vld [vmem:[%s154_s0] sm:$0xff]  ;;  %v15_v7 = vld [vmem:[%s154_s0 + $0x8] sm:$0xff] }
   0x4   :  { %84 = vmatpush.msra.mxu2 %v20_v1  ;;  %85 = vmatpush.msra.mxu3 %v20_v1  ;;  %v92_v8 = vld [vmem:[%s153_s2] ss:$0 sm:$0xff] }
   0x5   :  { %52 = vmatpush.msra.mxu0 %v20_v1  ;;  %83 = vmatpush.msra.mxu1 %v20_v1 }
   0x6   :  { %87 = vmatpush.msra.mxu2 %v19_v2  ;;  %88 = vmatpush.msra.mxu3 %v19_v2 }
   0x7   :  { %53 = vmatpush.msra.mxu0 %v19_v2  ;;  %86 = vmatpush.msra.mxu1 %v19_v2 }
   0x8   :  { %90 = vmatpush.msra.mxu2 %v18_v3  ;;  %91 = vmatpush.msra.mxu3 %v18_v3 }
   0x9   :  { %78 = vmatmul.msk.f32.vlgmr.msra.gmra.mxu2 %vm26_vm0, %v16_v4  ;;  %79 = vmatmul.msk.f32.vlgmr.msra.gmra.mxu3 %vm26_vm0, %v17_v5 }
   0xa   :  { %54 = vmatpush.msra.mxu0 %v18_v3  ;;  %89 = vmatpush.msra.mxu1 %v18_v3 }
   0xb   :  { %76 = vmatmul.msk.f32.vlgmr.msra.gmra.mxu0 %vm26_vm0, %v14_v6  ;;  %77 = vmatmul.msk.f32.vlgmr.msra.gmra.mxu1 %vm26_vm0, %v15_v7 }
  0x88   :  { %v56_v9 = vpop.f32.mrf.mxu0  ;;  %v59_v10 = vpop.f32.mrf.mxu1 }
  0x89   :  { %v57_v11 = vadd.f32 %v92_v8, %v56_v9  ;;  %v60_v12 = vadd.f32 %v92_v8, %v59_v10 }
  0x8b   :  { %68 = vst [vmem:[%s155_s3] sm:$0xff] %v57_v11 }
  0x8c   :  { %69 = vst [vmem:[%s155_s3 + $0x8] sm:$0xff] %v60_v12  ;;  %v62_v13 = vpop.f32.mrf.mxu2  ;;  %v65_v14 = vpop.f32.mrf.mxu3 }
  0x8d   :  { %v63_v15 = vadd.f32 %v92_v8, %v62_v13  ;;  %v66_v16 = vadd.f32 %v92_v8, %v65_v14 }
  0x8f   :  { %70 = vst [vmem:[%s155_s3 + $0x10] sm:$0xff] %v63_v15 }
  0x90   :  { %71 = vst [vmem:[%s155_s3 + $0x18] sm:$0xff] %v66_v16 }

// kernel: e2e_forward.22
= control target key start
LH: loop header
LB: loop body
LE: loop exit
PB: predicated region body
PF: predicated region fallthrough
CT: control target
= control target key end

     0   :  { %vm26_vm0 = vcmask 261120   ;;  %s160_s1 = inlined_call_operand.vmem [shape: f32[32,32], index: 1, kind: input, shape index: {}]   ;;  %s161_s2 = inlined_call_operand.vmem [shape: f32[1,32], index: 2, kind: input, shape index: {}]   ;;  %s162_s0 = inlined_call_operand.vmem [shape: f32[32,32], index: 0, kind: input, shape index: {}]   ;;  %s163_s3 = inlined_call_operand.vmem [shape: f32[32,32], index: 3, kind: output, shape index: {}]  }
   0x1   :  { %v21_v0 = vld [vmem:[%s160_s1 + $0x18] sm:$0xff]  ;;  %v20_v1 = vld [vmem:[%s160_s1 + $0x10] sm:$0xff]  ;;  %v19_v2 = vld [vmem:[%s160_s1 + $0x8] sm:$0xff] }
   0x2   :  { %81 = vmatpush.msra.mxu2 %v21_v0  ;;  %82 = vmatpush.msra.mxu3 %v21_v0  ;;  %v18_v3 = vld [vmem:[%s160_s1] sm:$0xff]  ;;  %v16_v4 = vld [vmem:[%s162_s0 + $0x10] sm:$0xff]  ;;  %v17_v5 = vld [vmem:[%s162_s0 + $0x18] sm:$0xff] }
   0x3   :  { %51 = vmatpush.msra.mxu0 %v21_v0  ;;  %80 = vmatpush.msra.mxu1 %v21_v0  ;;  %v14_v6 = vld [vmem:[%s162_s0] sm:$0xff]  ;;  %v15_v7 = vld [vmem:[%s162_s0 + $0x8] sm:$0xff] }
   0x4   :  { %84 = vmatpush.msra.mxu2 %v20_v1  ;;  %85 = vmatpush.msra.mxu3 %v20_v1  ;;  %v92_v8 = vld [vmem:[%s161_s2] ss:$0 sm:$0xff] }
   0x5   :  { %52 = vmatpush.msra.mxu0 %v20_v1  ;;  %83 = vmatpush.msra.mxu1 %v20_v1 }
   0x6   :  { %87 = vmatpush.msra.mxu2 %v19_v2  ;;  %88 = vmatpush.msra.mxu3 %v19_v2 }
   0x7   :  { %53 = vmatpush.msra.mxu0 %v19_v2  ;;  %86 = vmatpush.msra.mxu1 %v19_v2 }
   0x8   :  { %90 = vmatpush.msra.mxu2 %v18_v3  ;;  %91 = vmatpush.msra.mxu3 %v18_v3 }
   0x9   :  { %78 = vmatmul.msk.f32.vlgmr.msra.gmra.mxu2 %vm26_vm0, %v16_v4  ;;  %79 = vmatmul.msk.f32.vlgmr.msra.gmra.mxu3 %vm26_vm0, %v17_v5 }
   0xa   :  { %54 = vmatpush.msra.mxu0 %v18_v3  ;;  %89 = vmatpush.msra.mxu1 %v18_v3 }
   0xb   :  { %76 = vmatmul.msk.f32.vlgmr.msra.gmra.mxu0 %vm26_vm0, %v14_v6  ;;  %77 = vmatmul.msk.f32.vlgmr.msra.gmra.mxu1 %vm26_vm0, %v15_v7 }
  0x88   :  { %v56_v9 = vpop.f32.mrf.mxu0  ;;  %v59_v10 = vpop.f32.mrf.mxu1 }
  0x89   :  { %v57_v11 = vadd.f32 %v92_v8, %v56_v9  ;;  %v60_v12 = vadd.f32 %v92_v8, %v59_v10 }
  0x8b   :  { %68 = vst.msk [vmem:[%s163_s3] sm:$0xff] %vm26_vm0, %v57_v11 }
  0x8c   :  { %69 = vst.msk [vmem:[%s163_s3 + $0x8] sm:$0xff] %vm26_vm0, %v60_v12  ;;  %v62_v13 = vpop.f32.mrf.mxu2  ;;  %v65_v14 = vpop.f32.mrf.mxu3 }
  0x8d   :  { %v63_v15 = vadd.f32 %v92_v8, %v62_v13  ;;  %v66_v16 = vadd.f32 %v92_v8, %v65_v14 }
  0x8f   :  { %70 = vst.msk [vmem:[%s163_s3 + $0x10] sm:$0xff] %vm26_vm0, %v63_v15 }
  0x90   :  { %71 = vst.msk [vmem:[%s163_s3 + $0x18] sm:$0xff] %vm26_vm0, %v66_v16 }

// kernel: e2e_forward.23
= control target key start
LH: loop header
LB: loop body
LE: loop exit
PB: predicated region body
PF: predicated region fallthrough
CT: control target
= control target key end

     0   :  { %s1452_s26 = smov 0   ;;  %s1722_s0 = inlined_call_operand.vmem [shape: f32[8,2,32], index: 0, kind: input, shape index: {}]   ;;  %s1723_s1 = inlined_call_operand.vmem [shape: f32[2,16,32], index: 1, kind: input, shape index: {}]   ;;  %s1724_s2 = inlined_call_operand.vmem [shape: f32[2,16,32], index: 2, kind: input, shape index: {}]   ;;  %s1725_s3 = inlined_call_operand.vmem [shape: f32[2,16], index: 3, kind: input, shape index: {}]   ;;  %s1726_s4 = inlined_call_operand.vmem [shape: f32[2,16], index: 4, kind: input, shape index: {}]   ;;  %s1727_s5 = inlined_call_operand.vmem [shape: f32[32,32], index: 5, kind: input, shape index: {}]   ;;  %s1728_s6 = inlined_call_operand.vmem [shape: f32[5,32], index: 6, kind: input, shape index: {}]   ;;  %s1729_s7 = inlined_call_operand.vmem [shape: f32[1,32], index: 7, kind: input, shape index: {}]   ;;  %s1730_s8 = inlined_call_operand.vmem [shape: f32[1,32], index: 8, kind: input, shape index: {}]   ;;  %s1731_s9 = inlined_call_operand.vmem [shape: f32[32,10], index: 9, kind: input, shape index: {}]   ;;  %s1732_s10 = inlined_call_operand.vmem [shape: f32[1,10], index: 10, kind: input, shape index: {}]   ;;  %s1733_s11 = inlined_call_operand.vmem [shape: f32[10,32], index: 11, kind: input, shape index: {}]   ;;  %s1734_s12 = inlined_call_operand.vmem [shape: f32[64,128], index: 12, kind: input, shape index: {}]   ;;  %s1735_s13 = inlined_call_operand.vmem [shape: f32[32,128], index: 13, kind: input, shape index: {}]   ;;  %s1736_s14 = inlined_call_operand.vmem [shape: f32[1,128], index: 14, kind: input, shape index: {}]   ;;  %s1737_s15 = inlined_call_operand.vmem [shape: f32[32,128], index: 15, kind: input, shape index: {}]   ;;  %s1738_s16 = inlined_call_operand.vmem [shape: f32[32,128], index: 16, kind: input, shape index: {}]   ;;  %s1739_s17 = inlined_call_operand.vmem [shape: f32[1,128], index: 17, kind: input, shape index: {}]   ;;  %s1740_s18 = inlined_call_operand.vmem [shape: f32[8,2,10], index: 18, kind: output, shape index: {}]  }
   0x1   :  { %1743 = sst [smem:[#allocation7_spill]] %s1722_s0 }
   0x2   :  { %1744 = sst [smem:[#allocation8_spill]] %s1723_s1 }
   0x3   :  { %1745 = sst [smem:[#allocation9_spill]] %s1724_s2 }
   0x4 LB: > { %s1255_s27 = sadd.s32 4294967295, %s1350_s26   ;;  %p1259_p0 = scmp.ge.s32.totalorder %s1350_s26, 1  ;;  %s1350_s26 = sphi %s1452_s26, %s28_s26  }
   0x5   : > { %p511_p1 = scmp.lt.s32.totalorder %s1350_s26, 9 }
   0x7   : > { %p512_p2 = pnand %p1259_p0, %p511_p1 }
   0x8   : > { %p563_p3 = scmp.lt.s32.totalorder (!%p512_p2), %s1255_s27, 7  ;;  %s1746_s19 = sld [smem:[#allocation7_spill]] (!%p512_p2) }
   0x9   : > { %515 = sbr.rel (%p512_p2) target bundleno = 2301 (0x8fd), region = 92  ;;  %p1262_p4 = scmp.ne.s32.totalorder (!%p512_p2), %s1255_s27, 0 }
   0xe   : > { %s564_s28 = scalar_select %p563_p3, %s1255_s27, 7 }
   0xf   : > { %574 = sbr.rel (%p1262_p4) target bundleno = 27 (0x1b), region = 96 }
  0x10   : > { %s1260_s29 = sshll.u32 %s564_s28, 1 }
  0x11   : > { %s1463_s1 = scalar_lea.vmem %s1746_s19, %s1260_s29  ;;  %s1468_s22 = scalar_lea.vmem %s1740_s18, %s1260_s29 }
  0x14   : > { %vm575_vm0 = vcmask 254976   ;;  %v1352_v0 = vmov 0.0   ;;  %v581_v1 = vld [vmem:[%s1726_s4] sm:$0x3]  ;;  %vm582_vm1 = vcmask 123904  }
  0x15   : > { %576 = vst.msk [vmem:[#allocation2] sm:$0x3] %vm575_vm0, %v1352_v0 }
  0x16   : > { %577 = vst.msk [vmem:[#allocation2 + $0x2] sm:$0x3] %vm575_vm0, %v1352_v0 }
  0x17   : > { %578 = vst.msk [vmem:[#allocation3] sm:$0x3] %vm575_vm0, %v1352_v0 }
  0x18   : > { %579 = vst.msk [vmem:[#allocation3 + $0x2] sm:$0x3] %vm575_vm0, %v1352_v0 }
  0x19   : > { %580 = vst.msk [vmem:[#allocation4] sm:$0x3] %vm575_vm0, %v1352_v0 }
  0x1a   : > { %583 = vst.msk [vmem:[#allocation5] sm:$0x3] %vm582_vm1, %v581_v1 }
  0x1b PF: > { %v594_v3 = vlaneseq  ;;  %s1353_s24 = smov 2   ;;  %vm589_vm2 = vcmask 15360   ;;  %vm591_vm3 = vcmask 146432   ;;  %v769_v11 = vld [vmem:[%s1727_s5 + $0x18] sm:$0xff]  ;;  %v768_v12 = vld [vmem:[%s1727_s5 + $0x10] sm:$0xff]  ;;  %v767_v15 = vld [vmem:[%s1727_s5 + $0x8] sm:$0xff] }
  0x1c   : > { %786 = vmatpush.msra.mxu0 %v769_v11  ;;  %v766_v16 = vld [vmem:[%s1727_s5] sm:$0xff]  ;;  %vm770_vm4 = vcmask 261120   ;;  %s1747_s30 = sld [smem:[#allocation8_spill]]  ;;  %vm855_vm5 = vcmask 130112   ;;  %vm860_vm6 = vcmask 1041409   ;;  %vm864_vm8 = vcmask 123904  }
  0x1d   : > { %v1474_v4 = vshrl.u32 %v594_v3, 7  ;;  %v1514_v34 = vld [vmem:[%s1728_s6] ss:$0 sm:$0xff]  ;;  %v1519_v35 = vld [vmem:[%s1728_s6 + $0x1] ss:$0 sm:$0xff]  ;;  %s1748_s28 = sld [smem:[#allocation9_spill]] }
  0x1e   : > { %787 = vmatpush.msra.mxu0 %v768_v12  ;;  %v1525_v37 = vld [vmem:[%s1728_s6 + $0x2] ss:$0 sm:$0xff]  ;;  %v1534_v44 = vld [vmem:[%s1728_s6 + $0x3] ss:$0 sm:$0xff]  ;;  %v1543_v50 = vld [vmem:[%s1728_s6 + $0x4] ss:$0 sm:$0xff] }
  0x1f   : > { %1286 = vset.pattern.permute.xlu0 %v1474_v4  ;;  %v1478_v5 = vadd.s32 8, %v1474_v4  ;;  %v631_v13 = vadd.s32 1, %v1474_v4  ;;  %v637_v14 = vadd.s32 9, %v1474_v4  ;;  %v699_v18 = vadd.s32 3, %v1474_v4  ;;  %v1549_v55 = vld [vmem:[%s1729_s7] ss:$0 sm:$0xff] }
  0x20   : > { %788 = vmatpush.msra.mxu0 %v767_v15  ;;  %v765_v17 = vld [vmem:[#allocation4] sm:$0x3]  ;;  %v671_v19 = vadd.s32 10, %v1474_v4  ;;  %v665_v20 = vadd.s32 2, %v1474_v4  ;;  %v739_v21 = vadd.s32 12, %v1474_v4  ;;  %v705_v22 = vadd.s32 11, %v1474_v4 }
  0x21   : > { %v584_v2 = vld [vmem:[#allocation5] sm:$0x3]  ;;  %1289 = vset.pattern.permute.xlu2 %v1478_v5  ;;  %1287 = vset.pattern.permute.xlu1 %v1478_v5  ;;  %v733_v23 = vadd.s32 4, %v1474_v4  ;;  %v1312_v62 = vld [vmem:[%s1730_s8] ss:$0 sm:$0xff]  ;;  %s1354_s20 = smov 32  }
  0x22   : > { %586 = vrot.lane.b32.xlu0 %v584_v2, %s1353_s24  ;;  %789 = vmatpush.msra.mxu0 %v766_v16  ;;  %v794_v48 = vld [vmem:[%s1747_s30] sm:$0xff]  ;;  %vm974_vm9 = vcmask 523264   ;;  %s1355_s23 = smov 64   ;;  %vm1049_vm14 = vcmask 254976   ;;  %s1356_s21 = smov 96  }
  0x23   : > { %1263 = vmatmul.msk.f32.vlgmr.msra.gmra.mxu0 %vm770_vm4, %v765_v17 }
  0x94   : > { %v587_v6 = vpop.permute.xlu0 %586 }
  0x95   : > { %v590_v7 = vsel %vm589_vm2, 0.0, %v587_v6 }
  0x96   : > { %v592_v8 = vsel %vm591_vm3, %v590_v7, 0.0  ;;  %vm1200_vm3 = vcmask 74752  }
  0x97   : > { %v593_v9 = vperm.slane %v592_v8, 0  ;;  %v606_v10 = vperm.slane %v592_v8, 1 }
  0x99   : > { %617 = vperm.xlu2 %1289, %v606_v10   ;;  %604 = vperm.xlu1 %1287, %v593_v9  }
  0x9a   : > { %598 = vperm.xlu0 %1286, %v593_v9  }
  0xa0   : > { %v791_v42 = vpop.f32.mrf.mxu0 }
  0xa1   : > { %1290 = vset.pattern.permute.xlu2 %v631_v13  ;;  %1288 = vset.pattern.permute.xlu1 %v1474_v4  ;;  %v800_v47 = vperm.slane %v791_v42, 0  ;;  %v799_v13 = vrot.slane %v791_v42, 1 }
  0xa2   : > { %1292 = vset.pattern.permute.xlu0 %v637_v14 }
  0xa3   : > { %v804_v52 = vadd.f32 %v800_v47, %v794_v48 }
  0xa9   : > { %633 = vperm.xlu2 %1290, %v593_v9   ;;  %611 = vperm.xlu1 %1288, %v606_v10  }
  0xaa   : > { %651 = vperm.xlu0 %1292, %v606_v10  }
  0xb1   : > { %645 = vperm.xlu2 %1290, %v606_v10   ;;  %1291 = vset.pattern.permute.xlu1 %v637_v14 }
  0xb2   : > { %1295 = vset.pattern.permute.xlu0 %v699_v18 }
  0xb9   : > { %1294 = vset.pattern.permute.xlu2 %v671_v19  ;;  %639 = vperm.xlu1 %1291, %v593_v9  }
  0xba   : > { %701 = vperm.xlu0 %1295, %v593_v9  }
  0xc1   : > { %673 = vperm.xlu2 %1294, %v593_v9   ;;  %1293 = vset.pattern.permute.xlu1 %v665_v20  ;;  %v801_v20 = vperm.slane %v799_v13, 0 }
  0xc2   : > { %1299 = vset.pattern.permute.xlu0 %v739_v21 }
  0xc9   : > { %685 = vperm.xlu2 %1294, %v606_v10   ;;  %667 = vperm.xlu1 %1293, %v593_v9  }
  0xca   : > { %741 = vperm.xlu0 %1299, %v593_v9  }
  0xd1   : > { %1297 = vset.pattern.permute.xlu2 %v699_v18  ;;  %679 = vperm.xlu1 %1293, %v606_v10  }
  0xd2   : > { %1302 = vset.pattern.permute.xlu0 %v1474_v4 }
  0xd9   : > { %713 = vperm.xlu2 %1297, %v606_v10   ;;  %1296 = vset.pattern.permute.xlu1 %v705_v22  ;;  %v797_v22 = vld [vmem:[%s1747_s30 + $0x18] sm:$0xff] }
  0xe1   : > { %1298 = vset.pattern.permute.xlu2 %v733_v23  ;;  %707 = vperm.xlu1 %1296, %v593_v9  }
  0xe9   : > { %735 = vperm.xlu2 %1298, %v593_v9   ;;  %719 = vperm.xlu1 %1296, %v606_v10  }
  0xf1   : > { %1301 = vset.pattern.permute.xlu2 %v739_v21  ;;  %1300 = vset.pattern.permute.xlu1 %v733_v23 }
  0xf3   : > { %v618_v24 = vpop.permute.xlu2 %617 }
  0xf4   : > { %v624_v16 = vmul.f32 %v1514_v34, %v618_v24 }
  0xf9   : > { %753 = vperm.xlu2 %1301, %v606_v10   ;;  %747 = vperm.xlu1 %1300, %v606_v10  }
 0x101   : > { %1304 = vset.pattern.permute.xlu2 %v1474_v4  ;;  %1303 = vset.pattern.permute.xlu1 %v1478_v5  ;;  %v795_v4 = vld [vmem:[%s1747_s30 + $0x8] sm:$0xff] }
 0x102   : > { %v805_v14 = vadd.f32 %v800_v47, %v795_v4 }
 0x103   : > { %v634_v25 = vpop.permute.xlu2 %633 }
 0x104   : > { %v655_v40 = vmul.f32 %v1519_v35, %v634_v25 }
 0x10b   : > { %v1507_v26 = vpop.permute.xlu2 %645  ;;  %v605_v27 = vpop.permute.xlu1 %604 }
 0x10c   : > { %v599_v30 = vpop.permute.xlu0 %598  ;;  %v622_v61 = vmul.f32 %v1514_v34, %v605_v27 }
 0x10d   : > { %v621_v36 = vmul.f32 %v1514_v34, %v599_v30 }
 0x10f   : > { %v659_v43 = vadd.f32 %v655_v40, %v621_v36 }
 0x11b   : > { %v674_v28 = vpop.permute.xlu2 %673  ;;  %v1509_v29 = vpop.permute.xlu1 %611 }
 0x11c   : > { %v652_v33 = vpop.permute.xlu0 %651  ;;  %v690_v1 = vmul.f32 %v1525_v37, %v674_v28  ;;  %v623_v36 = vmul.f32 %v1514_v34, %v1509_v29  ;;  %v796_v29 = vld [vmem:[%s1747_s30 + $0x10] sm:$0xff] }
 0x11d   : > { %v658_v10 = vmul.f32 %v1519_v35, %v652_v33 }
 0x11f   : > { %v662_v19 = vadd.f32 %v658_v10, %v624_v16 }
 0x123   : > { %v686_v31 = vpop.permute.xlu2 %685 }
 0x124   : > { %v692_v17 = vmul.f32 %v1525_v37, %v686_v31 }
 0x126   : > { %v696_v27 = vadd.f32 %v692_v17, %v662_v19 }
 0x12b   : > { %v640_v32 = vpop.permute.xlu1 %639 }
 0x12c   : > { %v702_v45 = vpop.permute.xlu0 %701  ;;  %v656_v60 = vmul.f32 %v1519_v35, %v640_v32  ;;  %v807_v32 = vadd.f32 %v801_v20, %v797_v22  ;;  %v944_v22 = vld [vmem:[%s1734_s12 + $0x30] sm:$0xff] }
 0x12d   : > { %v723_v49 = vmul.f32 %v1534_v44, %v702_v45 }
 0x12e   : > { %v660_v63 = vadd.f32 %v656_v60, %v622_v61  ;;  %v851_v60 = vand.u32 127, %v594_v3 }
 0x130   : > { %v694_v8 = vadd.f32 %v690_v1, %v660_v63  ;;  %v853_v61 = vadd.s32 4294967288, %v851_v60  ;;  %v844_v1 = vld [vmem:[%s1725_s3] sm:$0x3] }
 0x131   : > { %vm845_vm7 = vcmp.gt.f32.partialorder %v844_v1, 0.0 }
 0x133   : > { %v1527_v38 = vpop.permute.xlu2 %713 }
 0x13b   : > { %v668_v39 = vpop.permute.xlu1 %667 }
 0x13c   : > { %v689_v41 = vmul.f32 %v1525_v37, %v668_v39  ;;  %v742_v2 = vpop.permute.xlu0 %741 }
 0x13d   : > { %v758_v12 = vmul.f32 %v1543_v50, %v742_v2 }
 0x13e   : > { %v693_v46 = vadd.f32 %v689_v41, %v659_v43  ;;  %v657_v41 = vmul.f32 %v1519_v35, %v1507_v26 }
 0x140   : > { %v727_v53 = vadd.f32 %v723_v49, %v693_v46  ;;  %v661_v46 = vadd.f32 %v657_v41, %v623_v36  ;;  %v725_v49 = vmul.f32 %v1534_v44, %v1527_v38  ;;  %v940_v36 = vld [vmem:[%s1734_s12 + $0x10] sm:$0xff] }
 0x143   : > { %v736_v51 = vpop.permute.xlu2 %735  ;;  %v680_v59 = vpop.permute.xlu1 %679 }
 0x144   : > { %v757_v54 = vmul.f32 %v1543_v50, %v736_v51  ;;  %v691_v42 = vmul.f32 %v1525_v37, %v680_v59 }
 0x146   : > { %v761_v56 = vadd.f32 %v757_v54, %v727_v53  ;;  %v695_v48 = vadd.f32 %v691_v42, %v661_v46 }
 0x148   : > { %v808_v57 = vadd.f32 %v804_v52, %v761_v56  ;;  %v729_v35 = vadd.f32 %v725_v49, %v695_v48  ;;  %v806_v52 = vadd.f32 %v801_v20, %v796_v29 }
 0x14a   : > { %v816_v58 = vadd.f32 %v1549_v55, %v808_v57 }
 0x14c   : > { %1316 = vtanh.f32 %v816_v58 }
 0x152   : > { %v1317_v0 = vpop.eup %1316 }
 0x153   : > { %v708_v6 = vpop.permute.xlu1 %707  ;;  %v828_v7 = vmul.f32 %v1317_v0, %v1312_v62  ;;  %v754_v23 = vpop.permute.xlu2 %753 }
 0x154   : > { %v724_v9 = vmul.f32 %v1534_v44, %v708_v6  ;;  %v760_v24 = vmul.f32 %v1543_v50, %v754_v23  ;;  %v943_v23 = vld [vmem:[%s1734_s12 + $0x28] sm:$0xff] }
 0x155   : > { %v832_v11 = vsel %vm770_vm4, %v828_v7, 0.0 }
 0x156   : > { %v728_v15 = vadd.f32 %v724_v9, %v694_v8  ;;  %833 = vadd.xlane.f32.xlu1 %v832_v11 }
 0x158   : > { %v762_v18 = vadd.f32 %v758_v12, %v728_v15 }
 0x15a   : > { %v809_v21 = vadd.f32 %v805_v14, %v762_v18 }
 0x15b   : > { %v720_v25 = vpop.permute.xlu1 %719 }
 0x15c   : > { %v817_v28 = vadd.f32 %v1549_v55, %v809_v21  ;;  %v726_v30 = vmul.f32 %v1534_v44, %v720_v25  ;;  %v945_v21 = vld [vmem:[%s1734_s12 + $0x38] sm:$0xff]  ;;  %v905_v25 = vld [vmem:[%s1748_s28 + $0x8] sm:$0xff] }
 0x15d   : > { %986 = vmatpush.msra.mxu2 %v945_v21 }
 0x15e   : > { %1318 = vtanh.f32 %v817_v28  ;;  %v730_v31 = vadd.f32 %v726_v30, %v696_v27  ;;  %v942_v27 = vld [vmem:[%s1734_s12 + $0x20] sm:$0xff] }
 0x15f   : > { %987 = vmatpush.msra.mxu2 %v944_v22 }
 0x160   : > { %v764_v33 = vadd.f32 %v760_v24, %v730_v31  ;;  %v941_v24 = vld [vmem:[%s1734_s12 + $0x18] sm:$0xff] }
 0x161   : > { %988 = vmatpush.msra.mxu2 %v943_v23 }
 0x162   : > { %v811_v39 = vadd.f32 %v807_v32, %v764_v33 }
 0x163   : > { %989 = vmatpush.msra.mxu2 %v942_v27 }
 0x164   : > { %v1319_v40 = vpop.eup %1318  ;;  %v819_v43 = vadd.f32 %v1549_v55, %v811_v39  ;;  %v906_v39 = vld [vmem:[%s1748_s28 + $0x10] sm:$0xff] }
 0x165   : > { %v829_v45 = vmul.f32 %v1319_v40, %v1312_v62  ;;  %990 = vmatpush.msra.mxu2 %v941_v24 }
 0x166   : > { %1320 = vtanh.f32 %v819_v43  ;;  %v939_v43 = vld [vmem:[%s1734_s12 + $0x8] sm:$0xff] }
 0x167   : > { %v835_v47 = vsel %vm770_vm4, %v829_v45, 0.0  ;;  %v907_v45 = vld [vmem:[%s1748_s28 + $0x18] sm:$0xff]  ;;  %991 = vmatpush.msra.mxu2 %v940_v36 }
 0x168   : > { %836 = vadd.xlane.f32.xlu2 %v835_v47  ;;  %v1059_v36 = vld [vmem:[%s1737_s15 + $0x18] sm:$0xff] }
 0x169   : > { %992 = vmatpush.msra.mxu2 %v939_v43  ;;  %1103 = vmatpush.msrb.mxu0 %v1059_v36  ;;  %v1061_v43 = vld [vmem:[#allocation2 + $0x2] sm:$0x3] }
 0x16b   : > { %v748_v34 = vpop.permute.xlu1 %747 }
 0x16c   : > { %v1321_v26 = vpop.eup %1320  ;;  %v759_v37 = vmul.f32 %v1543_v50, %v748_v34 }
 0x16d   : > { %v831_v51 = vmul.f32 %v1321_v26, %v1312_v62 }
 0x16e   : > { %v763_v53 = vadd.f32 %v759_v37, %v729_v35 }
 0x16f   : > { %v841_v54 = vsel %vm770_vm4, %v831_v51, 0.0 }
 0x170   : > { %v810_v56 = vadd.f32 %v806_v52, %v763_v53  ;;  %842 = vadd.xlane.f32.xlu2 %v841_v54 }
 0x172   : > { %v818_v57 = vadd.f32 %v1549_v55, %v810_v56 }
 0x174   : > { %1322 = vtanh.f32 %v818_v57 }
 0x17a   : > { %v1323_v38 = vpop.eup %1322 }
 0x17b   : > { %v830_v44 = vmul.f32 %v1323_v38, %v1312_v62 }
 0x17d   : > { %v838_v58 = vsel %vm770_vm4, %v830_v44, 0.0 }
 0x17e   : > { %839 = vadd.xlane.f32.xlu0 %v838_v58 }
 0x1c9   : > { %v834_v50 = vpop.xlane.xlu1 %833 }
 0x1ca   : > { %v852_v55 = vperm.slane %v834_v50, %v851_v60  ;;  %v949_v50 = vld [vmem:[%s1735_s13 + $0x10] sm:$0xff] }
 0x1db   : > { %v837_v59 = vpop.xlane.xlu2 %836 }
 0x1dc   : > { %v854_v0 = vperm.slane %v837_v59, %v853_v61 }
 0x1de   : > { %v856_v62 = vsel %vm855_vm5, %v854_v0, %v852_v55  ;;  %v1023_v0 = vld [vmem:[#allocation3] sm:$0x3]  ;;  %v930_v55 = vld [vmem:[%s1463_s1] sm:$0x3] }
 0x1e3   : > { %v843_v63 = vpop.xlane.xlu2 %842 }
 0x1e4   : > { %v858_v4 = vperm.slane %v843_v63, %v853_v61  ;;  %v938_v61 = vld [vmem:[%s1734_s12] sm:$0xff]  ;;  %v948_v63 = vld [vmem:[%s1735_s13 + $0x8] sm:$0xff] }
 0x1e5   : > { %993 = vmatpush.msra.mxu2 %v938_v61 }
 0x1f1   : > { %v840_v2 = vpop.xlane.xlu0 %839 }
 0x1f2   : > { %v857_v6 = vperm.slane %v840_v2, %v851_v60  ;;  %v950_v60 = vld [vmem:[%s1735_s13 + $0x18] sm:$0xff]  ;;  %v946_v2 = vld [vmem:[#allocation2] sm:$0x3] }
 0x1f3   : > { %966 = vmatpush.msra.mxu1 %v950_v60 }
 0x1f4   : > { %v859_v7 = vsel %vm855_vm5, %v858_v4, %v857_v6 }
 0x1f5   : > { %v861_v3 = vsel %vm860_vm6, %v859_v7, %v856_v62  ;;  %967 = vmatpush.msra.mxu1 %v949_v50  ;;  %v1313_v7 = vld [vmem:[%s1736_s14] ss:$0 sm:$0xff] }
 0x1f6   : > { %v863_v8 = vsel %vm845_vm7, %v861_v3, -1e+30 }
 0x1f7   : > { %v865_v9 = vsel %vm864_vm8, %v863_v8, -inf  ;;  %968 = vmatpush.msra.mxu1 %v948_v63 }
 0x1f8   : > { %866 = vmax.xlane.f32.xlu1 %v865_v9 }
 0x26b   : > { %v867_v10 = vpop.xlane.xlu1 %866 }
 0x26c   : > { %v868_v11 = vsub.f32 %v863_v8, %v867_v10 }
 0x26e   : > { %v869_v12 = vmul.f32 1.442695, %v868_v11 }
 0x270   : > { %1324 = vpow2.f32 %v869_v12 }
 0x276   : > { %v1325_v13 = vpop.eup %1324 }
 0x277   : > { %v871_v14 = vmul.f32 %v1325_v13, %v844_v1  ;;  %v947_v1 = vld [vmem:[%s1735_s13] sm:$0xff] }
 0x278   : > { %969 = vmatpush.msra.mxu1 %v947_v1 }
 0x279   : > { %v872_v15 = vsel %vm864_vm8, %v871_v14, 0.0  ;;  %1264 = vmatmul.msk.f32.vlgmr.msra.gmra.mxu1 %vm770_vm4, %v946_v2 }
 0x27a   : > { %873 = vadd.xlane.f32.xlu2 %v872_v15 }
 0x2ed   : > { %v874_v16 = vpop.xlane.xlu2 %873 }
 0x2ee   : > { %1326 = vrcp.f32 %v874_v16 }
 0x2f4   : > { %v1327_v17 = vpop.eup %1326 }
 0x2f5   : > { %v876_v18 = vmul.f32 %v1327_v17, %v871_v14 }
 0x2f6   : > { %v971_v62 = vpop.f32.mrf.mxu1 }
 0x2f7   : > { %877 = vst.msk [vmem:[#allocation5] sm:$0x3] %vm864_vm8, %v876_v18  ;;  %v891_v19 = vperm.slane %v876_v18, 1  ;;  %v878_v20 = vperm.slane %v876_v18, 0 }
 0x2f9   : > { %896 = vperm.xlu2 %1304, %v891_v19   ;;  %889 = vperm.xlu1 %1303, %v878_v20  }
 0x2fa   : > { %883 = vperm.xlu0 %1302, %v878_v20  }
 0x301   : > { %902 = vperm.xlu1 %1303, %v891_v19  }
 0x302   : > { %1305 = vset.pattern.permute.xlu0 %v1478_v5  ;;  %v904_v5 = vld [vmem:[%s1748_s28] sm:$0xff] }
 0x353   : > { %v897_v40 = vpop.permute.xlu2 %896 }
 0x354   : > { %v910_v46 = vmul.f32 %v906_v39, %v897_v40  ;;  %v1063_v39 = vld [vmem:[%s1738_s16 + $0x8] sm:$0xff]  ;;  %v1058_v40 = vld [vmem:[%s1737_s15 + $0x10] sm:$0xff] }
 0x355   : > { %1104 = vmatpush.msrb.mxu0 %v1058_v40 }
 0x356   : > { %v921_v34 = vsel %vm770_vm4, %v910_v46, 0.0 }
 0x36b   : > { %v890_v28 = vpop.permute.xlu1 %889 }
 0x36c   : > { %v909_v30 = vmul.f32 %v905_v25, %v890_v28  ;;  %v884_v32 = vpop.permute.xlu0 %883 }
 0x36d   : > { %v908_v31 = vmul.f32 %v904_v5, %v884_v32 }
 0x36e   : > { %v913_v33 = vsel %vm770_vm4, %v909_v30, 0.0 }
 0x36f   : > { %v912_v41 = vsel %vm770_vm4, %v908_v31, 0.0  ;;  %v1065_v31 = vld [vmem:[%s1738_s16 + $0x18] sm:$0xff] }
 0x370   : > { %v914_v42 = vadd.f32 %v913_v33, %v912_v41  ;;  %v1064_v33 = vld [vmem:[%s1738_s16 + $0x10] sm:$0xff]  ;;  %1081 = vmatpush.msra.mxu3 %v1065_v31  ;;  %v1057_v41 = vld [vmem:[%s1737_s15 + $0x8] sm:$0xff] }
 0x371   : > { %1105 = vmatpush.msrb.mxu0 %v1057_v41 }
 0x372   : > { %v915_v47 = vrot.slane %v914_v42, 4  ;;  %1082 = vmatpush.msra.mxu3 %v1064_v33 }
 0x373   : > { %v903_v48 = vpop.permute.xlu1 %902 }
 0x374   : > { %v916_v49 = vadd.f32 %v915_v47, %v914_v42  ;;  %v911_v29 = vmul.f32 %v907_v45, %v903_v48  ;;  %v1062_v42 = vld [vmem:[%s1738_s16] sm:$0xff]  ;;  %1083 = vmatpush.msra.mxu3 %v1063_v39 }
 0x375   : > { %v1056_v45 = vld [vmem:[%s1737_s15] sm:$0xff] }
 0x376   : > { %v922_v26 = vsel %vm770_vm4, %v911_v29, 0.0  ;;  %v917_v35 = vrot.slane %v916_v49, 2  ;;  %1084 = vmatpush.msra.mxu3 %v1062_v42  ;;  %1106 = vmatpush.msrb.mxu0 %v1056_v45  ;;  %v1137_v48 = vld [vmem:[#allocation3 + $0x2] sm:$0x3] }
 0x377   : > { %v923_v37 = vadd.f32 %v922_v26, %v921_v34  ;;  %1267 = vmatmul.msk.f32.vlgmr.msra.gmra.mxu3 %vm770_vm4, %v1061_v43  ;;  %v1314_v34 = vld [vmem:[%s1739_s17] ss:$0 sm:$0xff] }
 0x378   : > { %v918_v52 = vadd.f32 %v917_v35, %v916_v49 }
 0x379   : > { %v924_v51 = vrot.slane %v923_v37, 4 }
 0x37a   : > { %v919_v57 = vrot.slane %v918_v52, 1 }
 0x37b   : > { %v925_v53 = vadd.f32 %v924_v51, %v923_v37 }
 0x37c   : > { %v920_v44 = vadd.f32 %v919_v57, %v918_v52 }
 0x37d   : > { %v926_v54 = vrot.slane %v925_v53, 2 }
 0x37f   : > { %v927_v56 = vadd.f32 %v926_v54, %v925_v53 }
 0x381   : > { %v928_v38 = vrot.slane %v927_v56, 1 }
 0x383   : > { %v929_v58 = vadd.f32 %v928_v38, %v927_v56 }
 0x385   : > { %v933_v59 = vsel %vm860_vm6, %v929_v58, %v920_v44 }
 0x386   : > { %934 = vrot.lane.b32.xlu2 %v933_v59, %s1354_s20 }
 0x38e   : > { %1025 = vrot.lane.b32.xlu2 %v1023_v0, %s1354_s20 }
 0x3e0   : > { %v935_v4 = vpop.permute.xlu2 %934 }
 0x3e1   : > { %v937_v6 = vsel %vm770_vm4, %v930_v55, %v935_v4 }
 0x3e2   : > { %1265 = vmatmul.msk.f32.vlgmr.msra.gmra.mxu2 %vm974_vm9, %v937_v6 }
 0x3e8   : > { %v1026_v27 = vpop.permute.xlu2 %1025 }
 0x3fa   : > { %v1086_v29 = vpop.f32.mrf.mxu3 }
 0x465   : > { %v995_v3 = vpop.f32.mrf.mxu2 }
 0x466   : > { %v996_v8 = vadd.f32 %v995_v3, %v971_v62  ;;  %v1173_v3 = vld [vmem:[%s1731_s9 + $0x18] sm:$0xff] }
 0x467   : > { %1192 = vmatpush.msrb.mxu1 %v1173_v3 }
 0x468   : > { %v1002_v9 = vadd.f32 %v1313_v7, %v996_v8  ;;  %v1172_v8 = vld [vmem:[%s1731_s9 + $0x10] sm:$0xff] }
 0x469   : > { %1193 = vmatpush.msrb.mxu1 %v1172_v8 }
 0x46a   : > { %1328 = vtanh.f32 %v1002_v9  ;;  %v1266_v11 = vmul.f32 -1.442695, %v1002_v9  ;;  %v1171_v9 = vld [vmem:[%s1731_s9 + $0x8] sm:$0xff] }
 0x46b   : > { %1194 = vmatpush.msrb.mxu1 %v1171_v9 }
 0x46c   : > { %1330 = vpow2.f32 %v1266_v11 }
 0x470   : > { %v1329_v10 = vpop.eup %1328 }
 0x471   : > { %1030 = vrot.lane.b32.xlu1 %v1329_v10, %s1355_s23  ;;  %v1170_v10 = vld [vmem:[%s1731_s9] sm:$0xff] }
 0x472   : > { %v1331_v12 = vpop.eup %1330  ;;  %1195 = vmatpush.msrb.mxu1 %v1170_v10 }
 0x473   : > { %v1006_v13 = vadd.f32 1.0, %v1331_v12 }
 0x475   : > { %1332 = vrcp.f32 %v1006_v13  ;;  %v1018_v19 = vand.u32 2147483648, %v1006_v13  ;;  %vm1012_vm11 = vweird.f32 %v1006_v13  ;;  %v1016_v20 = vand.u32 2147483647, %v1006_v13 }
 0x477   : > { %v1019_v22 = vor.u32 1.1754944e-38, %v1018_v19  ;;  %vm1017_vm13 = vcmp.eq.f32.partialorder %v1016_v20, 8.507059e+37 }
 0x47b   : > { %v1333_v14 = vpop.eup %1332 }
 0x47c   : > { %v1008_v15 = vmul.f32 %v1333_v14, %v1006_v13  ;;  %vm1013_vm10 = vweird.f32 %v1333_v14 }
 0x47d   : > { %vm1014_vm12 = vmor %vm1012_vm11, %vm1013_vm10 }
 0x47e   : > { %v1009_v16 = vsub.f32 1.0, %v1008_v15  ;;  %v1315_v15 = vld [vmem:[%s1732_s10] ss:$0 sm:$0xff] }
 0x480   : > { %v1010_v17 = vmul.f32 %v1333_v14, %v1009_v16 }
 0x482   : > { %v1011_v18 = vadd.f32 %v1333_v14, %v1010_v17 }
 0x484   : > { %v1015_v21 = vsel %vm1014_vm12, %v1333_v14, %v1011_v18 }
 0x485   : > { %v1020_v23 = vsel %vm1017_vm13, %v1019_v22, %v1015_v21 }
 0x486   : > { %v1028_v28 = vmul.f32 %v1026_v27, %v1020_v23 }
 0x4e3   : > { %v1031_v25 = vpop.permute.xlu1 %1030 }
 0x4e4   : > { %v1033_v5 = vmul.f32 %v1031_v25, %v1020_v23 }
 0x4e6   : > { %1035 = vrot.lane.b32.xlu0 %v1033_v5, %s1354_s20 }
 0x558   : > { %v1036_v30 = vpop.permute.xlu0 %1035 }
 0x559   : > { %v1038_v32 = vadd.f32 %v1036_v30, %v1028_v28 }
 0x55b   : > { %1334 = vtanh.f32 %v1038_v32 }
 0x561   : > { %v1335_v24 = vpop.eup %1334 }
 0x562   : > { %1041 = vrot.lane.b32.xlu1 %v1335_v24, %s1355_s23 }
 0x56a   : > { %1139 = vrot.lane.b32.xlu1 %v1137_v48, %s1354_s20 }
 0x5d4   : > { %v1042_v46 = vpop.permute.xlu1 %1041 }
 0x5d5   : > { %v1044_v47 = vmul.f32 %v1042_v46, %v1020_v23 }
 0x5d7   : > { %1046 = vrot.lane.b32.xlu2 %v1044_v47, %s1354_s20 }
 0x5dc   : > { %v1140_v2 = vpop.permute.xlu1 %1139 }
 0x631   : > { %v1047_v49 = vpop.permute.xlu2 %1046 }
 0x632   : > { %1050 = vst.msk [vmem:[#allocation2] sm:$0x3] %vm1049_vm14, %v1047_v49  ;;  %1268 = vmatmul.msk.f32.vlgmr.msrb.gmra.mxu0 %vm770_vm4, %v1047_v49 }
 0x6af   : > { %v1108_v26 = vpop.f32.mrf.mxu0 }
 0x6b0   : > { %v1109_v35 = vadd.f32 %v1108_v26, %v1086_v29 }
 0x6b2   : > { %v1115_v37 = vadd.f32 %v1314_v34, %v1109_v35 }
 0x6b4   : > { %1336 = vtanh.f32 %v1115_v37  ;;  %v1269_v52 = vmul.f32 -1.442695, %v1115_v37 }
 0x6b6   : > { %1338 = vpow2.f32 %v1269_v52 }
 0x6ba   : > { %v1337_v51 = vpop.eup %1336 }
 0x6bb   : > { %1144 = vrot.lane.b32.xlu0 %v1337_v51, %s1355_s23 }
 0x6bc   : > { %v1339_v53 = vpop.eup %1338 }
 0x6bd   : > { %v1119_v54 = vadd.f32 1.0, %v1339_v53 }
 0x6bf   : > { %1340 = vrcp.f32 %v1119_v54  ;;  %v1131_v59 = vand.u32 2147483648, %v1119_v54  ;;  %vm1125_vm0 = vweird.f32 %v1119_v54  ;;  %v1129_v60 = vand.u32 2147483647, %v1119_v54 }
 0x6c1   : > { %v1132_v50 = vor.u32 1.1754944e-38, %v1131_v59  ;;  %vm1130_vm2 = vcmp.eq.f32.partialorder %v1129_v60, 8.507059e+37 }
 0x6c5   : > { %v1341_v56 = vpop.eup %1340 }
 0x6c6   : > { %v1121_v57 = vmul.f32 %v1341_v56, %v1119_v54  ;;  %vm1126_vm15 = vweird.f32 %v1341_v56 }
 0x6c7   : > { %vm1127_vm1 = vmor %vm1125_vm0, %vm1126_vm15 }
 0x6c8   : > { %v1122_v38 = vsub.f32 1.0, %v1121_v57 }
 0x6ca   : > { %v1123_v44 = vmul.f32 %v1341_v56, %v1122_v38 }
 0x6cc   : > { %v1124_v58 = vadd.f32 %v1341_v56, %v1123_v44 }
 0x6ce   : > { %v1128_v61 = vsel %vm1127_vm1, %v1341_v56, %v1124_v58 }
 0x6cf   : > { %v1133_v63 = vsel %vm1130_vm2, %v1132_v50, %v1128_v61 }
 0x6d0   : > { %v1142_v55 = vmul.f32 %v1140_v2, %v1133_v63 }
 0x72d   : > { %v1145_v0 = vpop.permute.xlu0 %1144 }
 0x72e   : > { %v1147_v1 = vmul.f32 %v1145_v0, %v1133_v63 }
 0x730   : > { %1149 = vrot.lane.b32.xlu2 %v1147_v1, %s1354_s20 }
 0x738   : > { %1052 = vrot.lane.b32.xlu2 %v1038_v32, %s1356_s21 }
 0x78a   : > { %v1150_v4 = vpop.permute.xlu2 %1149 }
 0x78b   : > { %v1152_v6 = vadd.f32 %v1150_v4, %v1142_v55 }
 0x78d   : > { %1342 = vtanh.f32 %v1152_v6 }
 0x792   : > { %v1053_v62 = vpop.permute.xlu2 %1052 }
 0x793   : > { %v1343_v7 = vpop.eup %1342  ;;  %1055 = vst.msk [vmem:[#allocation3] sm:$0x3] %vm1049_vm14, %v1053_v62 }
 0x794   : > { %1155 = vrot.lane.b32.xlu0 %v1343_v7, %s1355_s23 }
 0x79c   : > { %1165 = vrot.lane.b32.xlu0 %v1152_v6, %s1356_s21 }
 0x806   : > { %v1156_v11 = vpop.permute.xlu0 %1155 }
 0x807   : > { %v1158_v12 = vmul.f32 %v1156_v11, %v1133_v63 }
 0x809   : > { %1160 = vrot.lane.b32.xlu1 %v1158_v12, %s1354_s20 }
 0x80e   : > { %v1166_v13 = vpop.permute.xlu0 %1165 }
 0x80f   : > { %1168 = vst.msk [vmem:[#allocation3 + $0x2] sm:$0x3] %vm1049_vm14, %v1166_v13 }
 0x87b   : > { %v1161_v14 = vpop.permute.xlu1 %1160 }
 0x87c   : > { %1163 = vst.msk [vmem:[#allocation2 + $0x2] sm:$0x3] %vm1049_vm14, %v1161_v14  ;;  %1270 = vmatmul.msk.f32.vlgmr.msrb.gmra.mxu1 %vm770_vm4, %v1161_v14 }
 0x87d   : > { %1169 = vst.msk [vmem:[#allocation4] sm:$0x3] %vm1049_vm14, %v1161_v14 }
 0x8f9   : > { %v1197_v16 = vpop.f32.mrf.mxu1 }
 0x8fa   : > { %v1198_v17 = vadd.f32 %v1315_v15, %v1197_v16 }
 0x8fc   : > { %1201 = vst.msk [vmem:[%s1468_s22] sm:$0x3] %vm1200_vm3, %v1198_v17 }
 0x8fd PF: > { %s28_s26 = sadd.s32 1, %s1350_s26  }
 0x8fe   : > { %p25_p5 = scmp.ge.s32.totalorder %s28_s26, 10  }
 0x900   :  { %27 = sbr.rel (!%p25_p5) target bundleno = 4 (0x4), region = 128 }

</bundles_post_ra>
